<compile_context>
chip_gen: v5e
topology: v5e:2x2
jax: 0.10.0
libtpu: 0.0.40
codegen_flags: <defaults>
</compile_context>

<pallas_src>
import functools

import jax
import jax.numpy as jnp
from jax.experimental import pallas as pl
from jax.experimental.pallas import tpu as pltpu

# ---- small synthetic cross-encoder config ----
VOCAB = 100
HIDDEN = 32
N_HEADS = 2
HEAD_DIM = HIDDEN // N_HEADS
N_LAYERS = 2
FFN = 64
NUM_LABELS = 2
MAX_POS = 16
EPS = 1e-5
NEG_INF = 1e9  # magnitude of the additive mask


# -------------------- fused Pallas kernel --------------------

def _cross_encoder_kernel(B, S,
                          x_ref, mask_ref, emb_g_ref, emb_b_ref,
                          qkv_w_ref, qkv_b_ref, o_w_ref, o_b_ref,
                          ln1_g_ref, ln1_b_ref,
                          ffn1_w_ref, ffn1_b_ref, ffn2_w_ref, ffn2_b_ref,
                          ln2_g_ref, ln2_b_ref,
                          pool_w_ref, pool_b_ref, cls_w_ref, cls_b_ref,
                          out_ref):
    """Single invocation: the whole batch as one T = B*S token slab."""
    scale = 1.0 / float(HEAD_DIM) ** 0.5
    mask = mask_ref[...]                               # [T, T] additive (0 / -1e9)

    def layer_norm(x, g, b):                           # f32 math over hidden
        mu = jnp.mean(x, axis=-1, keepdims=True)
        xc = x - mu
        var = jnp.mean(xc * xc, axis=-1, keepdims=True)
        return xc * jax.lax.rsqrt(var + EPS) * g + b

    def mm(x_bf16, w_bf16):                            # bf16 MXU, f32 accumulate
        return jnp.dot(x_bf16, w_bf16, preferred_element_type=jnp.float32)

    # embedding LayerNorm (no zero residual materialized)
    h = layer_norm(x_ref[...], emb_g_ref[...], emb_b_ref[...])       # [T, H] f32

    for l in range(N_LAYERS):
        # ---- multi-head self-attention (heads unrolled, per-head weight slabs) ----
        hb = h.astype(jnp.bfloat16)                    # cast once, reused 6x
        ctx_proj = jnp.zeros_like(h)                   # [T, H]
        for hd in range(N_HEADS):
            iq = (l * 3 + 0) * N_HEADS + hd
            ik = (l * 3 + 1) * N_HEADS + hd
            iv = (l * 3 + 2) * N_HEADS + hd
            # scale folded into Q (cheaper than rescaling the [T,T] scores)
            q = (mm(hb, qkv_w_ref[iq]) + qkv_b_ref[iq]) * scale      # [T, dh]
            k = mm(hb, qkv_w_ref[ik]) + qkv_b_ref[ik]                # [T, dh]
            v = mm(hb, qkv_w_ref[iv]) + qkv_b_ref[iv]                # [T, dh]

            # scores = q @ k^T (contract head dim, no explicit transpose)
            s = jax.lax.dot_general(
                q.astype(jnp.bfloat16), k.astype(jnp.bfloat16),
                (((1,), (1,)), ((), ())),
                preferred_element_type=jnp.float32) + mask           # [T, T]

            # softmax in f32 (EUP exp / reciprocal)
            mx = jnp.max(s, axis=-1, keepdims=True)
            p = jnp.exp(s - mx)
            inv = pl.reciprocal(jnp.sum(p, axis=-1, keepdims=True), approx=True)
            ctx = mm(p.astype(jnp.bfloat16), v.astype(jnp.bfloat16)) * inv  # [T, dh]

            # per-head output projection accumulated == concat(heads) @ Wo
            ctx_proj = ctx_proj + mm(ctx.astype(jnp.bfloat16),
                                     o_w_ref[l * N_HEADS + hd])      # [T, H]

        h = layer_norm(ctx_proj + o_b_ref[l] + h, ln1_g_ref[l], ln1_b_ref[l])

        # ---- FFN ----
        ff = mm(h.astype(jnp.bfloat16), ffn1_w_ref[l]) + ffn1_b_ref[l]   # [T, FFN]
        # tanh-approx GELU (matches HF gelu_new)
        ff = 0.5 * ff * (1.0 + jnp.tanh(0.7978845608028654 *
                                        (ff + 0.044715 * ff * ff * ff)))
        ff = mm(ff.astype(jnp.bfloat16), ffn2_w_ref[l]) + ffn2_b_ref[l]  # [T, H]
        h = layer_norm(ff + h, ln2_g_ref[l], ln2_b_ref[l])

    # ---- BERT pooler (tanh on [CLS]) + classification head, fused epilogue ----
    # CLS rows are the first token of each stacked sequence (static slices).
    cls = jnp.concatenate([h[b * S:b * S + 1, :] for b in range(B)], axis=0)  # [B, H]
    pooled = jnp.tanh(mm(cls.astype(jnp.bfloat16), pool_w_ref[...])
                      + pool_b_ref[...])                                       # [B, H]
    logits = mm(pooled.astype(jnp.bfloat16), cls_w_ref[...]) + cls_b_ref[...]  # [B, NL]
    out_ref[...] = logits


# -------------------- parameters --------------------

def init_params(key):
    def norm(k, shape, dtype=jnp.float32):
        return (jax.random.normal(k, shape, jnp.float32) * 0.02).astype(dtype)

    keys = iter(jax.random.split(key, 16))
    L, H, nH, dh = N_LAYERS, HIDDEN, N_HEADS, HEAD_DIM
    p = {
        "word_emb": norm(next(keys), (VOCAB, H)),
        "pos_emb": norm(next(keys), (MAX_POS, H)),
        "type_emb": norm(next(keys), (2, H)),
        "emb_ln_g": jnp.ones((1, H), jnp.float32),
        "emb_ln_b": jnp.zeros((1, H), jnp.float32),
        # per-head QKV weight slabs: [L, {q,k,v}, head, H, dh]  (bf16 for MXU)
        "qkv_w": norm(next(keys), (L, 3, nH, H, dh), jnp.bfloat16),
        "qkv_b": jnp.zeros((L, 3, nH, 1, dh), jnp.float32),
        # per-head output projection: [L, head, dh, H]
        "o_w": norm(next(keys), (L, nH, dh, H), jnp.bfloat16),
        "o_b": jnp.zeros((L, 1, H), jnp.float32),
        "ln1_g": jnp.ones((L, 1, H), jnp.float32),
        "ln1_b": jnp.zeros((L, 1, H), jnp.float32),
        "ffn1_w": norm(next(keys), (L, H, FFN), jnp.bfloat16),
        "ffn1_b": jnp.zeros((L, 1, FFN), jnp.float32),
        "ffn2_w": norm(next(keys), (L, FFN, H), jnp.bfloat16),
        "ffn2_b": jnp.zeros((L, 1, H), jnp.float32),
        "ln2_g": jnp.ones((L, 1, H), jnp.float32),
        "ln2_b": jnp.zeros((L, 1, H), jnp.float32),
        "pool_w": norm(next(keys), (H, H), jnp.bfloat16),
        "pool_b": jnp.zeros((1, H), jnp.float32),
        "cls_w": norm(next(keys), (H, NUM_LABELS), jnp.bfloat16),
        "cls_b": jnp.zeros((1, NUM_LABELS), jnp.float32),
    }
    return p


# -------------------- forward (cross_encoder(**input) -> logits) --------------------

def _full_spec(shape):
    n = len(shape)
    return pl.BlockSpec(shape, lambda i, _n=n: (0,) * _n)


def cross_encoder_forward(params, input_ids, token_type_ids, attention_mask):
    B, S = input_ids.shape
    T = B * S
    H, L, nH, dh = HIDDEN, N_LAYERS, N_HEADS, HEAD_DIM

    # embeddings (gather = glue, stays in JAX)
    emb = (params["word_emb"][input_ids]
           + params["pos_emb"][jnp.arange(S)][None, :, :]
           + params["type_emb"][token_type_ids])
    x = emb.reshape(T, H).astype(jnp.float32)

    # additive attention mask over the flattened batch: 0 where the query and
    # key belong to the SAME sequence and the key is a real (non-padding)
    # token, -1e9 everywhere else (padding keys + cross-sequence positions).
    valid = attention_mask.astype(jnp.float32).reshape(T)          # [T]
    bid = jnp.repeat(jnp.arange(B), S)                              # [T]
    same = (bid[:, None] == bid[None, :]).astype(jnp.float32)       # [T, T]
    mask_add = (same * valid[None, :] - 1.0) * NEG_INF              # [T, T]

    # flatten stacked leading weight axes (free reshape) so the kernel indexes
    # a single leading axis with a static int.
    qkv_w = params["qkv_w"].reshape(L * 3 * nH, H, dh)
    qkv_b = params["qkv_b"].reshape(L * 3 * nH, 1, dh)
    o_w = params["o_w"].reshape(L * nH, dh, H)

    in_specs = [
        _full_spec((T, H)),                                 # token slab
        _full_spec((T, T)),                                 # additive mask
        _full_spec((1, H)), _full_spec((1, H)),             # emb LN
        _full_spec((L * 3 * nH, H, dh)), _full_spec((L * 3 * nH, 1, dh)),
        _full_spec((L * nH, dh, H)), _full_spec((L, 1, H)),
        _full_spec((L, 1, H)), _full_spec((L, 1, H)),
        _full_spec((L, H, FFN)), _full_spec((L, 1, FFN)),
        _full_spec((L, FFN, H)), _full_spec((L, 1, H)),
        _full_spec((L, 1, H)), _full_spec((L, 1, H)),
        _full_spec((H, H)), _full_spec((1, H)),
        _full_spec((H, NUM_LABELS)), _full_spec((1, NUM_LABELS)),
    ]

    kernel = functools.partial(_cross_encoder_kernel, B, S)
    logits = pl.pallas_call(
        kernel,
        out_shape=jax.ShapeDtypeStruct((B, NUM_LABELS), jnp.float32),
        grid=(1,),
        in_specs=in_specs,
        out_specs=_full_spec((B, NUM_LABELS)),
        compiler_params=pltpu.CompilerParams(
            dimension_semantics=("arbitrary",)),
    )(x, mask_add,
      params["emb_ln_g"], params["emb_ln_b"],
      qkv_w, qkv_b, o_w, params["o_b"],
      params["ln1_g"], params["ln1_b"],
      params["ffn1_w"], params["ffn1_b"], params["ffn2_w"], params["ffn2_b"],
      params["ln2_g"], params["ln2_b"],
      params["pool_w"], params["pool_b"], params["cls_w"], params["cls_b"])

    return logits


# TODO(synk): gradient_checkpointing_enable() is a training-time memory feature
# with no forward-pass semantics; not represented in the kernel.
# TODO(synk): at real BERT scale (H=768, S=512, large B) the whole-batch
# block-diagonal fusion would be O((B*S)^2); restore a batch/sequence-tiled
# grid with M/K/N BlockSpec tiling and an explicit vmem_limit_bytes
# (v7x: 64 MiB VMEM) for that regime.


if __name__ == "__main__":
    key = jax.random.PRNGKey(0)
    pkey, ikey = jax.random.split(key)
    params = init_params(pkey)

    B, S = 2, 8
    input_ids = jax.random.randint(ikey, (B, S), 0, VOCAB, dtype=jnp.int32)
    # cross-encoder pair input: first half segment 0, second half segment 1
    token_type_ids = jnp.concatenate(
        [jnp.zeros((B, S // 2), jnp.int32), jnp.ones((B, S // 2), jnp.int32)], axis=1)
    # second example has 2 padding tokens
    attention_mask = jnp.array(
        [[1, 1, 1, 1, 1, 1, 1, 1],
         [1, 1, 1, 1, 1, 1, 0, 0]], dtype=jnp.int32)

    fwd = jax.jit(cross_encoder_forward)
    logits = fwd(params, input_ids, token_type_ids, attention_mask)
    logits = jax.block_until_ready(logits)
    assert logits.shape == (B, NUM_LABELS)
    print("KERNEL_OK")
</pallas_src>

<mosaic_0001>
module attributes {stable_mosaic.version = 11 : i64} {
  func.func @_cross_encoder_kernel(%arg0: i32, %arg1: memref<16x32xf32, #tpu.memory_space<vmem>>, %arg2: memref<16x16xf32, #tpu.memory_space<vmem>>, %arg3: memref<1x32xf32, #tpu.memory_space<vmem>>, %arg4: memref<1x32xf32, #tpu.memory_space<vmem>>, %arg5: memref<12x32x16xbf16, #tpu.memory_space<vmem>>, %arg6: memref<12x1x16xf32, #tpu.memory_space<vmem>>, %arg7: memref<4x16x32xbf16, #tpu.memory_space<vmem>>, %arg8: memref<2x1x32xf32, #tpu.memory_space<vmem>>, %arg9: memref<2x1x32xf32, #tpu.memory_space<vmem>>, %arg10: memref<2x1x32xf32, #tpu.memory_space<vmem>>, %arg11: memref<2x32x64xbf16, #tpu.memory_space<vmem>>, %arg12: memref<2x1x64xf32, #tpu.memory_space<vmem>>, %arg13: memref<2x64x32xbf16, #tpu.memory_space<vmem>>, %arg14: memref<2x1x32xf32, #tpu.memory_space<vmem>>, %arg15: memref<2x1x32xf32, #tpu.memory_space<vmem>>, %arg16: memref<2x1x32xf32, #tpu.memory_space<vmem>>, %arg17: memref<32x32xbf16, #tpu.memory_space<vmem>>, %arg18: memref<1x32xf32, #tpu.memory_space<vmem>>, %arg19: memref<32x2xbf16, #tpu.memory_space<vmem>>, %arg20: memref<1x2xf32, #tpu.memory_space<vmem>>, %arg21: memref<2x2xf32, #tpu.memory_space<vmem>>) attributes {dimension_semantics = [#tpu.dimension_semantics<arbitrary>], iteration_bounds = array<i64: 1>, scalar_prefetch = 0 : i64, scratch_operands = 0 : i64, tpu.core_type = #tpu.core_type<tc>, window_params = [{pipeline_mode = #tpu.pipeline_mode<synchronous>, transform_indices = @transform_0, window_bounds = array<i64: 16, 32>}, {pipeline_mode = #tpu.pipeline_mode<synchronous>, transform_indices = @transform_1, window_bounds = array<i64: 16, 16>}, {pipeline_mode = #tpu.pipeline_mode<synchronous>, transform_indices = @transform_2, window_bounds = array<i64: 1, 32>}, {pipeline_mode = #tpu.pipeline_mode<synchronous>, transform_indices = @transform_3, window_bounds = array<i64: 1, 32>}, {pipeline_mode = #tpu.pipeline_mode<synchronous>, transform_indices = @transform_4, window_bounds = array<i64: 12, 32, 16>}, {pipeline_mode = #tpu.pipeline_mode<synchronous>, transform_indices = @transform_5, window_bounds = array<i64: 12, 1, 16>}, {pipeline_mode = #tpu.pipeline_mode<synchronous>, transform_indices = @transform_6, window_bounds = array<i64: 4, 16, 32>}, {pipeline_mode = #tpu.pipeline_mode<synchronous>, transform_indices = @transform_7, window_bounds = array<i64: 2, 1, 32>}, {pipeline_mode = #tpu.pipeline_mode<synchronous>, transform_indices = @transform_8, window_bounds = array<i64: 2, 1, 32>}, {pipeline_mode = #tpu.pipeline_mode<synchronous>, transform_indices = @transform_9, window_bounds = array<i64: 2, 1, 32>}, {pipeline_mode = #tpu.pipeline_mode<synchronous>, transform_indices = @transform_10, window_bounds = array<i64: 2, 32, 64>}, {pipeline_mode = #tpu.pipeline_mode<synchronous>, transform_indices = @transform_11, window_bounds = array<i64: 2, 1, 64>}, {pipeline_mode = #tpu.pipeline_mode<synchronous>, transform_indices = @transform_12, window_bounds = array<i64: 2, 64, 32>}, {pipeline_mode = #tpu.pipeline_mode<synchronous>, transform_indices = @transform_13, window_bounds = array<i64: 2, 1, 32>}, {pipeline_mode = #tpu.pipeline_mode<synchronous>, transform_indices = @transform_14, window_bounds = array<i64: 2, 1, 32>}, {pipeline_mode = #tpu.pipeline_mode<synchronous>, transform_indices = @transform_15, window_bounds = array<i64: 2, 1, 32>}, {pipeline_mode = #tpu.pipeline_mode<synchronous>, transform_indices = @transform_16, window_bounds = array<i64: 32, 32>}, {pipeline_mode = #tpu.pipeline_mode<synchronous>, transform_indices = @transform_17, window_bounds = array<i64: 1, 32>}, {pipeline_mode = #tpu.pipeline_mode<synchronous>, transform_indices = @transform_18, window_bounds = array<i64: 32, 2>}, {pipeline_mode = #tpu.pipeline_mode<synchronous>, transform_indices = @transform_19, window_bounds = array<i64: 1, 2>}, {pipeline_mode = #tpu.pipeline_mode<synchronous>, transform_indices = @transform_20, window_bounds = array<i64: 2, 2>}]} {
    %c0 = arith.constant 0 : index
    %c0_0 = arith.constant 0 : index
    %0 = vector.load %arg2[%c0, %c0_0] : memref<16x16xf32, #tpu.memory_space<vmem>>, vector<16x16xf32>
    %c0_1 = arith.constant 0 : index
    %c0_2 = arith.constant 0 : index
    %1 = vector.load %arg1[%c0_1, %c0_2] : memref<16x32xf32, #tpu.memory_space<vmem>>, vector<16x32xf32>
    %c0_3 = arith.constant 0 : index
    %c0_4 = arith.constant 0 : index
    %2 = vector.load %arg3[%c0_3, %c0_4] : memref<1x32xf32, #tpu.memory_space<vmem>>, vector<1x32xf32>
    %c0_5 = arith.constant 0 : index
    %c0_6 = arith.constant 0 : index
    %3 = vector.load %arg4[%c0_5, %c0_6] : memref<1x32xf32, #tpu.memory_space<vmem>>, vector<1x32xf32>
    %cst = arith.constant dense<0.000000e+00> : vector<16xf32>
    %4 = vector.multi_reduction <add>, %1, %cst [1] : vector<16x32xf32> to vector<16xf32>
    %5 = vector.shape_cast %4 : vector<16xf32> to vector<16x1xf32>
    %cst_7 = arith.constant 3.200000e+01 : f32
    %6 = vector.broadcast %cst_7 : f32 to vector<16x1xf32>
    %7 = arith.divf %5, %6 : vector<16x1xf32>
    %8 = vector.broadcast %7 : vector<16x1xf32> to vector<16x32xf32>
    %9 = arith.subf %1, %8 : vector<16x32xf32>
    %10 = arith.mulf %9, %9 : vector<16x32xf32>
    %cst_8 = arith.constant dense<0.000000e+00> : vector<16xf32>
    %11 = vector.multi_reduction <add>, %10, %cst_8 [1] : vector<16x32xf32> to vector<16xf32>
    %12 = vector.shape_cast %11 : vector<16xf32> to vector<16x1xf32>
    %cst_9 = arith.constant 3.200000e+01 : f32
    %13 = vector.broadcast %cst_9 : f32 to vector<16x1xf32>
    %14 = arith.divf %12, %13 : vector<16x1xf32>
    %cst_10 = arith.constant 9.99999974E-6 : f32
    %15 = vector.broadcast %cst_10 : f32 to vector<16x1xf32>
    %16 = arith.addf %14, %15 : vector<16x1xf32>
    %17 = math.rsqrt %16 : vector<16x1xf32>
    %18 = vector.broadcast %17 : vector<16x1xf32> to vector<16x32xf32>
    %19 = arith.mulf %9, %18 : vector<16x32xf32>
    %20 = vector.broadcast %2 : vector<1x32xf32> to vector<16x32xf32>
    %21 = arith.mulf %19, %20 : vector<16x32xf32>
    %22 = vector.broadcast %3 : vector<1x32xf32> to vector<16x32xf32>
    %23 = arith.addf %21, %22 : vector<16x32xf32>
    %24 = arith.truncf %23 : vector<16x32xf32> to vector<16x32xbf16>
    %cst_11 = arith.constant 0.000000e+00 : f32
    %25 = vector.broadcast %cst_11 : f32 to vector<16x32xf32>
    %c0_12 = arith.constant 0 : index
    %c0_13 = arith.constant 0 : index
    %c0_14 = arith.constant 0 : index
    %26 = vector.load %arg5[%c0_12, %c0_13, %c0_14] : memref<12x32x16xbf16, #tpu.memory_space<vmem>>, vector<1x32x16xbf16>
    %27 = vector.shape_cast %26 : vector<1x32x16xbf16> to vector<32x16xbf16>
    %cst_15 = arith.constant dense<0.000000e+00> : vector<16x16xf32>
    %28 = tpu.matmul %24, %27, %cst_15 {dimension_numbers = #tpu.dot_dimension_numbers<[1], [0], [0], [1], [0, 0, 1, 1], [], []>} : vector<16x32xbf16>, vector<32x16xbf16>, vector<16x16xf32> -> vector<16x16xf32>
    %c0_16 = arith.constant 0 : index
    %c0_17 = arith.constant 0 : index
    %c0_18 = arith.constant 0 : index
    %29 = vector.load %arg6[%c0_16, %c0_17, %c0_18] : memref<12x1x16xf32, #tpu.memory_space<vmem>>, vector<1x1x16xf32>
    %30 = vector.shape_cast %29 : vector<1x1x16xf32> to vector<1x16xf32>
    %31 = vector.broadcast %30 : vector<1x16xf32> to vector<16x16xf32>
    %32 = arith.addf %28, %31 : vector<16x16xf32>
    %cst_19 = arith.constant 2.500000e-01 : f32
    %33 = vector.broadcast %cst_19 : f32 to vector<16x16xf32>
    %34 = arith.mulf %32, %33 : vector<16x16xf32>
    %c2 = arith.constant 2 : index
    %c0_20 = arith.constant 0 : index
    %c0_21 = arith.constant 0 : index
    %35 = vector.load %arg5[%c2, %c0_20, %c0_21] : memref<12x32x16xbf16, #tpu.memory_space<vmem>>, vector<1x32x16xbf16>
    %36 = vector.shape_cast %35 : vector<1x32x16xbf16> to vector<32x16xbf16>
    %cst_22 = arith.constant dense<0.000000e+00> : vector<16x16xf32>
    %37 = tpu.matmul %24, %36, %cst_22 {dimension_numbers = #tpu.dot_dimension_numbers<[1], [0], [0], [1], [0, 0, 1, 1], [], []>} : vector<16x32xbf16>, vector<32x16xbf16>, vector<16x16xf32> -> vector<16x16xf32>
    %c2_23 = arith.constant 2 : index
    %c0_24 = arith.constant 0 : index
    %c0_25 = arith.constant 0 : index
    %38 = vector.load %arg6[%c2_23, %c0_24, %c0_25] : memref<12x1x16xf32, #tpu.memory_space<vmem>>, vector<1x1x16xf32>
    %39 = vector.shape_cast %38 : vector<1x1x16xf32> to vector<1x16xf32>
    %40 = vector.broadcast %39 : vector<1x16xf32> to vector<16x16xf32>
    %41 = arith.addf %37, %40 : vector<16x16xf32>
    %c4 = arith.constant 4 : index
    %c0_26 = arith.constant 0 : index
    %c0_27 = arith.constant 0 : index
    %42 = vector.load %arg5[%c4, %c0_26, %c0_27] : memref<12x32x16xbf16, #tpu.memory_space<vmem>>, vector<1x32x16xbf16>
    %43 = vector.shape_cast %42 : vector<1x32x16xbf16> to vector<32x16xbf16>
    %cst_28 = arith.constant dense<0.000000e+00> : vector<16x16xf32>
    %44 = tpu.matmul %24, %43, %cst_28 {dimension_numbers = #tpu.dot_dimension_numbers<[1], [0], [0], [1], [0, 0, 1, 1], [], []>} : vector<16x32xbf16>, vector<32x16xbf16>, vector<16x16xf32> -> vector<16x16xf32>
    %c4_29 = arith.constant 4 : index
    %c0_30 = arith.constant 0 : index
    %c0_31 = arith.constant 0 : index
    %45 = vector.load %arg6[%c4_29, %c0_30, %c0_31] : memref<12x1x16xf32, #tpu.memory_space<vmem>>, vector<1x1x16xf32>
    %46 = vector.shape_cast %45 : vector<1x1x16xf32> to vector<1x16xf32>
    %47 = vector.broadcast %46 : vector<1x16xf32> to vector<16x16xf32>
    %48 = arith.addf %44, %47 : vector<16x16xf32>
    %49 = arith.truncf %34 : vector<16x16xf32> to vector<16x16xbf16>
    %50 = arith.truncf %41 : vector<16x16xf32> to vector<16x16xbf16>
    %cst_32 = arith.constant dense<0.000000e+00> : vector<16x16xf32>
    %51 = tpu.matmul %49, %50, %cst_32 {dimension_numbers = #tpu.dot_dimension_numbers<[1], [1], [0], [0], [0, 0, 1, 0], [], []>} : vector<16x16xbf16>, vector<16x16xbf16>, vector<16x16xf32> -> vector<16x16xf32>
    %52 = arith.addf %51, %0 : vector<16x16xf32>
    %cst_33 = arith.constant dense<0xFF800000> : vector<16xf32>
    %53 = vector.multi_reduction <maximumf>, %52, %cst_33 [1] : vector<16x16xf32> to vector<16xf32>
    %54 = vector.shape_cast %53 : vector<16xf32> to vector<16x1xf32>
    %55 = vector.broadcast %54 : vector<16x1xf32> to vector<16x16xf32>
    %56 = arith.subf %52, %55 : vector<16x16xf32>
    %57 = math.exp %56 : vector<16x16xf32>
    %cst_34 = arith.constant dense<0.000000e+00> : vector<16xf32>
    %58 = vector.multi_reduction <add>, %57, %cst_34 [1] : vector<16x16xf32> to vector<16xf32>
    %59 = vector.shape_cast %58 : vector<16xf32> to vector<16x1xf32>
    %60 = tpu.reciprocal %59 {approx = true} : vector<16x1xf32> -> vector<16x1xf32>
    %61 = arith.truncf %57 : vector<16x16xf32> to vector<16x16xbf16>
    %62 = arith.truncf %48 : vector<16x16xf32> to vector<16x16xbf16>
    %cst_35 = arith.constant dense<0.000000e+00> : vector<16x16xf32>
    %63 = tpu.matmul %61, %62, %cst_35 {dimension_numbers = #tpu.dot_dimension_numbers<[1], [0], [0], [1], [0, 0, 1, 1], [], []>} : vector<16x16xbf16>, vector<16x16xbf16>, vector<16x16xf32> -> vector<16x16xf32>
    %64 = vector.broadcast %60 : vector<16x1xf32> to vector<16x16xf32>
    %65 = arith.mulf %63, %64 : vector<16x16xf32>
    %66 = arith.truncf %65 : vector<16x16xf32> to vector<16x16xbf16>
    %c0_36 = arith.constant 0 : index
    %c0_37 = arith.constant 0 : index
    %c0_38 = arith.constant 0 : index
    %67 = vector.load %arg7[%c0_36, %c0_37, %c0_38] : memref<4x16x32xbf16, #tpu.memory_space<vmem>>, vector<1x16x32xbf16>
    %68 = vector.shape_cast %67 : vector<1x16x32xbf16> to vector<16x32xbf16>
    %cst_39 = arith.constant dense<0.000000e+00> : vector<16x32xf32>
    %69 = tpu.matmul %66, %68, %cst_39 {dimension_numbers = #tpu.dot_dimension_numbers<[1], [0], [0], [1], [0, 0, 1, 1], [], []>} : vector<16x16xbf16>, vector<16x32xbf16>, vector<16x32xf32> -> vector<16x32xf32>
    %70 = arith.addf %25, %69 : vector<16x32xf32>
    %c1 = arith.constant 1 : index
    %c0_40 = arith.constant 0 : index
    %c0_41 = arith.constant 0 : index
    %71 = vector.load %arg5[%c1, %c0_40, %c0_41] : memref<12x32x16xbf16, #tpu.memory_space<vmem>>, vector<1x32x16xbf16>
    %72 = vector.shape_cast %71 : vector<1x32x16xbf16> to vector<32x16xbf16>
    %cst_42 = arith.constant dense<0.000000e+00> : vector<16x16xf32>
    %73 = tpu.matmul %24, %72, %cst_42 {dimension_numbers = #tpu.dot_dimension_numbers<[1], [0], [0], [1], [0, 0, 1, 1], [], []>} : vector<16x32xbf16>, vector<32x16xbf16>, vector<16x16xf32> -> vector<16x16xf32>
    %c1_43 = arith.constant 1 : index
    %c0_44 = arith.constant 0 : index
    %c0_45 = arith.constant 0 : index
    %74 = vector.load %arg6[%c1_43, %c0_44, %c0_45] : memref<12x1x16xf32, #tpu.memory_space<vmem>>, vector<1x1x16xf32>
    %75 = vector.shape_cast %74 : vector<1x1x16xf32> to vector<1x16xf32>
    %76 = vector.broadcast %75 : vector<1x16xf32> to vector<16x16xf32>
    %77 = arith.addf %73, %76 : vector<16x16xf32>
    %cst_46 = arith.constant 2.500000e-01 : f32
    %78 = vector.broadcast %cst_46 : f32 to vector<16x16xf32>
    %79 = arith.mulf %77, %78 : vector<16x16xf32>
    %c3 = arith.constant 3 : index
    %c0_47 = arith.constant 0 : index
    %c0_48 = arith.constant 0 : index
    %80 = vector.load %arg5[%c3, %c0_47, %c0_48] : memref<12x32x16xbf16, #tpu.memory_space<vmem>>, vector<1x32x16xbf16>
    %81 = vector.shape_cast %80 : vector<1x32x16xbf16> to vector<32x16xbf16>
    %cst_49 = arith.constant dense<0.000000e+00> : vector<16x16xf32>
    %82 = tpu.matmul %24, %81, %cst_49 {dimension_numbers = #tpu.dot_dimension_numbers<[1], [0], [0], [1], [0, 0, 1, 1], [], []>} : vector<16x32xbf16>, vector<32x16xbf16>, vector<16x16xf32> -> vector<16x16xf32>
    %c3_50 = arith.constant 3 : index
    %c0_51 = arith.constant 0 : index
    %c0_52 = arith.constant 0 : index
    %83 = vector.load %arg6[%c3_50, %c0_51, %c0_52] : memref<12x1x16xf32, #tpu.memory_space<vmem>>, vector<1x1x16xf32>
    %84 = vector.shape_cast %83 : vector<1x1x16xf32> to vector<1x16xf32>
    %85 = vector.broadcast %84 : vector<1x16xf32> to vector<16x16xf32>
    %86 = arith.addf %82, %85 : vector<16x16xf32>
    %c5 = arith.constant 5 : index
    %c0_53 = arith.constant 0 : index
    %c0_54 = arith.constant 0 : index
    %87 = vector.load %arg5[%c5, %c0_53, %c0_54] : memref<12x32x16xbf16, #tpu.memory_space<vmem>>, vector<1x32x16xbf16>
    %88 = vector.shape_cast %87 : vector<1x32x16xbf16> to vector<32x16xbf16>
    %cst_55 = arith.constant dense<0.000000e+00> : vector<16x16xf32>
    %89 = tpu.matmul %24, %88, %cst_55 {dimension_numbers = #tpu.dot_dimension_numbers<[1], [0], [0], [1], [0, 0, 1, 1], [], []>} : vector<16x32xbf16>, vector<32x16xbf16>, vector<16x16xf32> -> vector<16x16xf32>
    %c5_56 = arith.constant 5 : index
    %c0_57 = arith.constant 0 : index
    %c0_58 = arith.constant 0 : index
    %90 = vector.load %arg6[%c5_56, %c0_57, %c0_58] : memref<12x1x16xf32, #tpu.memory_space<vmem>>, vector<1x1x16xf32>
    %91 = vector.shape_cast %90 : vector<1x1x16xf32> to vector<1x16xf32>
    %92 = vector.broadcast %91 : vector<1x16xf32> to vector<16x16xf32>
    %93 = arith.addf %89, %92 : vector<16x16xf32>
    %94 = arith.truncf %79 : vector<16x16xf32> to vector<16x16xbf16>
    %95 = arith.truncf %86 : vector<16x16xf32> to vector<16x16xbf16>
    %cst_59 = arith.constant dense<0.000000e+00> : vector<16x16xf32>
    %96 = tpu.matmul %94, %95, %cst_59 {dimension_numbers = #tpu.dot_dimension_numbers<[1], [1], [0], [0], [0, 0, 1, 0], [], []>} : vector<16x16xbf16>, vector<16x16xbf16>, vector<16x16xf32> -> vector<16x16xf32>
    %97 = arith.addf %96, %0 : vector<16x16xf32>
    %cst_60 = arith.constant dense<0xFF800000> : vector<16xf32>
    %98 = vector.multi_reduction <maximumf>, %97, %cst_60 [1] : vector<16x16xf32> to vector<16xf32>
    %99 = vector.shape_cast %98 : vector<16xf32> to vector<16x1xf32>
    %100 = vector.broadcast %99 : vector<16x1xf32> to vector<16x16xf32>
    %101 = arith.subf %97, %100 : vector<16x16xf32>
    %102 = math.exp %101 : vector<16x16xf32>
    %cst_61 = arith.constant dense<0.000000e+00> : vector<16xf32>
    %103 = vector.multi_reduction <add>, %102, %cst_61 [1] : vector<16x16xf32> to vector<16xf32>
    %104 = vector.shape_cast %103 : vector<16xf32> to vector<16x1xf32>
    %105 = tpu.reciprocal %104 {approx = true} : vector<16x1xf32> -> vector<16x1xf32>
    %106 = arith.truncf %102 : vector<16x16xf32> to vector<16x16xbf16>
    %107 = arith.truncf %93 : vector<16x16xf32> to vector<16x16xbf16>
    %cst_62 = arith.constant dense<0.000000e+00> : vector<16x16xf32>
    %108 = tpu.matmul %106, %107, %cst_62 {dimension_numbers = #tpu.dot_dimension_numbers<[1], [0], [0], [1], [0, 0, 1, 1], [], []>} : vector<16x16xbf16>, vector<16x16xbf16>, vector<16x16xf32> -> vector<16x16xf32>
    %109 = vector.broadcast %105 : vector<16x1xf32> to vector<16x16xf32>
    %110 = arith.mulf %108, %109 : vector<16x16xf32>
    %111 = arith.truncf %110 : vector<16x16xf32> to vector<16x16xbf16>
    %c1_63 = arith.constant 1 : index
    %c0_64 = arith.constant 0 : index
    %c0_65 = arith.constant 0 : index
    %112 = vector.load %arg7[%c1_63, %c0_64, %c0_65] : memref<4x16x32xbf16, #tpu.memory_space<vmem>>, vector<1x16x32xbf16>
    %113 = vector.shape_cast %112 : vector<1x16x32xbf16> to vector<16x32xbf16>
    %cst_66 = arith.constant dense<0.000000e+00> : vector<16x32xf32>
    %114 = tpu.matmul %111, %113, %cst_66 {dimension_numbers = #tpu.dot_dimension_numbers<[1], [0], [0], [1], [0, 0, 1, 1], [], []>} : vector<16x16xbf16>, vector<16x32xbf16>, vector<16x32xf32> -> vector<16x32xf32>
    %115 = arith.addf %70, %114 : vector<16x32xf32>
    %c0_67 = arith.constant 0 : index
    %c0_68 = arith.constant 0 : index
    %c0_69 = arith.constant 0 : index
    %116 = vector.load %arg8[%c0_67, %c0_68, %c0_69] : memref<2x1x32xf32, #tpu.memory_space<vmem>>, vector<1x1x32xf32>
    %117 = vector.shape_cast %116 : vector<1x1x32xf32> to vector<1x32xf32>
    %118 = vector.broadcast %117 : vector<1x32xf32> to vector<16x32xf32>
    %119 = arith.addf %115, %118 : vector<16x32xf32>
    %120 = arith.addf %119, %23 : vector<16x32xf32>
    %c0_70 = arith.constant 0 : index
    %c0_71 = arith.constant 0 : index
    %c0_72 = arith.constant 0 : index
    %121 = vector.load %arg9[%c0_70, %c0_71, %c0_72] : memref<2x1x32xf32, #tpu.memory_space<vmem>>, vector<1x1x32xf32>
    %122 = vector.shape_cast %121 : vector<1x1x32xf32> to vector<1x32xf32>
    %c0_73 = arith.constant 0 : index
    %c0_74 = arith.constant 0 : index
    %c0_75 = arith.constant 0 : index
    %123 = vector.load %arg10[%c0_73, %c0_74, %c0_75] : memref<2x1x32xf32, #tpu.memory_space<vmem>>, vector<1x1x32xf32>
    %124 = vector.shape_cast %123 : vector<1x1x32xf32> to vector<1x32xf32>
    %cst_76 = arith.constant dense<0.000000e+00> : vector<16xf32>
    %125 = vector.multi_reduction <add>, %120, %cst_76 [1] : vector<16x32xf32> to vector<16xf32>
    %126 = vector.shape_cast %125 : vector<16xf32> to vector<16x1xf32>
    %cst_77 = arith.constant 3.200000e+01 : f32
    %127 = vector.broadcast %cst_77 : f32 to vector<16x1xf32>
    %128 = arith.divf %126, %127 : vector<16x1xf32>
    %129 = vector.broadcast %128 : vector<16x1xf32> to vector<16x32xf32>
    %130 = arith.subf %120, %129 : vector<16x32xf32>
    %131 = arith.mulf %130, %130 : vector<16x32xf32>
    %cst_78 = arith.constant dense<0.000000e+00> : vector<16xf32>
    %132 = vector.multi_reduction <add>, %131, %cst_78 [1] : vector<16x32xf32> to vector<16xf32>
    %133 = vector.shape_cast %132 : vector<16xf32> to vector<16x1xf32>
    %cst_79 = arith.constant 3.200000e+01 : f32
    %134 = vector.broadcast %cst_79 : f32 to vector<16x1xf32>
    %135 = arith.divf %133, %134 : vector<16x1xf32>
    %cst_80 = arith.constant 9.99999974E-6 : f32
    %136 = vector.broadcast %cst_80 : f32 to vector<16x1xf32>
    %137 = arith.addf %135, %136 : vector<16x1xf32>
    %138 = math.rsqrt %137 : vector<16x1xf32>
    %139 = vector.broadcast %138 : vector<16x1xf32> to vector<16x32xf32>
    %140 = arith.mulf %130, %139 : vector<16x32xf32>
    %141 = vector.broadcast %122 : vector<1x32xf32> to vector<16x32xf32>
    %142 = arith.mulf %140, %141 : vector<16x32xf32>
    %143 = vector.broadcast %124 : vector<1x32xf32> to vector<16x32xf32>
    %144 = arith.addf %142, %143 : vector<16x32xf32>
    %145 = arith.truncf %144 : vector<16x32xf32> to vector<16x32xbf16>
    %c0_81 = arith.constant 0 : index
    %c0_82 = arith.constant 0 : index
    %c0_83 = arith.constant 0 : index
    %146 = vector.load %arg11[%c0_81, %c0_82, %c0_83] : memref<2x32x64xbf16, #tpu.memory_space<vmem>>, vector<1x32x64xbf16>
    %147 = vector.shape_cast %146 : vector<1x32x64xbf16> to vector<32x64xbf16>
    %cst_84 = arith.constant dense<0.000000e+00> : vector<16x64xf32>
    %148 = tpu.matmul %145, %147, %cst_84 {dimension_numbers = #tpu.dot_dimension_numbers<[1], [0], [0], [1], [0, 0, 1, 1], [], []>} : vector<16x32xbf16>, vector<32x64xbf16>, vector<16x64xf32> -> vector<16x64xf32>
    %c0_85 = arith.constant 0 : index
    %c0_86 = arith.constant 0 : index
    %c0_87 = arith.constant 0 : index
    %149 = vector.load %arg12[%c0_85, %c0_86, %c0_87] : memref<2x1x64xf32, #tpu.memory_space<vmem>>, vector<1x1x64xf32>
    %150 = vector.shape_cast %149 : vector<1x1x64xf32> to vector<1x64xf32>
    %151 = vector.broadcast %150 : vector<1x64xf32> to vector<16x64xf32>
    %152 = arith.addf %148, %151 : vector<16x64xf32>
    %cst_88 = arith.constant 5.000000e-01 : f32
    %153 = vector.broadcast %cst_88 : f32 to vector<16x64xf32>
    %154 = arith.mulf %153, %152 : vector<16x64xf32>
    %cst_89 = arith.constant 4.471500e-02 : f32
    %155 = vector.broadcast %cst_89 : f32 to vector<16x64xf32>
    %156 = arith.mulf %155, %152 : vector<16x64xf32>
    %157 = arith.mulf %156, %152 : vector<16x64xf32>
    %158 = arith.mulf %157, %152 : vector<16x64xf32>
    %159 = arith.addf %152, %158 : vector<16x64xf32>
    %cst_90 = arith.constant 0.797884583 : f32
    %160 = vector.broadcast %cst_90 : f32 to vector<16x64xf32>
    %161 = arith.mulf %160, %159 : vector<16x64xf32>
    %162 = math.tanh %161 : vector<16x64xf32>
    %cst_91 = arith.constant 1.000000e+00 : f32
    %163 = vector.broadcast %cst_91 : f32 to vector<16x64xf32>
    %164 = arith.addf %163, %162 : vector<16x64xf32>
    %165 = arith.mulf %154, %164 : vector<16x64xf32>
    %166 = arith.truncf %165 : vector<16x64xf32> to vector<16x64xbf16>
    %c0_92 = arith.constant 0 : index
    %c0_93 = arith.constant 0 : index
    %c0_94 = arith.constant 0 : index
    %167 = vector.load %arg13[%c0_92, %c0_93, %c0_94] : memref<2x64x32xbf16, #tpu.memory_space<vmem>>, vector<1x64x32xbf16>
    %168 = vector.shape_cast %167 : vector<1x64x32xbf16> to vector<64x32xbf16>
    %cst_95 = arith.constant dense<0.000000e+00> : vector<16x32xf32>
    %169 = tpu.matmul %166, %168, %cst_95 {dimension_numbers = #tpu.dot_dimension_numbers<[1], [0], [0], [1], [0, 0, 1, 1], [], []>} : vector<16x64xbf16>, vector<64x32xbf16>, vector<16x32xf32> -> vector<16x32xf32>
    %c0_96 = arith.constant 0 : index
    %c0_97 = arith.constant 0 : index
    %c0_98 = arith.constant 0 : index
    %170 = vector.load %arg14[%c0_96, %c0_97, %c0_98] : memref<2x1x32xf32, #tpu.memory_space<vmem>>, vector<1x1x32xf32>
    %171 = vector.shape_cast %170 : vector<1x1x32xf32> to vector<1x32xf32>
    %172 = vector.broadcast %171 : vector<1x32xf32> to vector<16x32xf32>
    %173 = arith.addf %169, %172 : vector<16x32xf32>
    %174 = arith.addf %173, %144 : vector<16x32xf32>
    %c0_99 = arith.constant 0 : index
    %c0_100 = arith.constant 0 : index
    %c0_101 = arith.constant 0 : index
    %175 = vector.load %arg15[%c0_99, %c0_100, %c0_101] : memref<2x1x32xf32, #tpu.memory_space<vmem>>, vector<1x1x32xf32>
    %176 = vector.shape_cast %175 : vector<1x1x32xf32> to vector<1x32xf32>
    %c0_102 = arith.constant 0 : index
    %c0_103 = arith.constant 0 : index
    %c0_104 = arith.constant 0 : index
    %177 = vector.load %arg16[%c0_102, %c0_103, %c0_104] : memref<2x1x32xf32, #tpu.memory_space<vmem>>, vector<1x1x32xf32>
    %178 = vector.shape_cast %177 : vector<1x1x32xf32> to vector<1x32xf32>
    %cst_105 = arith.constant dense<0.000000e+00> : vector<16xf32>
    %179 = vector.multi_reduction <add>, %174, %cst_105 [1] : vector<16x32xf32> to vector<16xf32>
    %180 = vector.shape_cast %179 : vector<16xf32> to vector<16x1xf32>
    %cst_106 = arith.constant 3.200000e+01 : f32
    %181 = vector.broadcast %cst_106 : f32 to vector<16x1xf32>
    %182 = arith.divf %180, %181 : vector<16x1xf32>
    %183 = vector.broadcast %182 : vector<16x1xf32> to vector<16x32xf32>
    %184 = arith.subf %174, %183 : vector<16x32xf32>
    %185 = arith.mulf %184, %184 : vector<16x32xf32>
    %cst_107 = arith.constant dense<0.000000e+00> : vector<16xf32>
    %186 = vector.multi_reduction <add>, %185, %cst_107 [1] : vector<16x32xf32> to vector<16xf32>
    %187 = vector.shape_cast %186 : vector<16xf32> to vector<16x1xf32>
    %cst_108 = arith.constant 3.200000e+01 : f32
    %188 = vector.broadcast %cst_108 : f32 to vector<16x1xf32>
    %189 = arith.divf %187, %188 : vector<16x1xf32>
    %cst_109 = arith.constant 9.99999974E-6 : f32
    %190 = vector.broadcast %cst_109 : f32 to vector<16x1xf32>
    %191 = arith.addf %189, %190 : vector<16x1xf32>
    %192 = math.rsqrt %191 : vector<16x1xf32>
    %193 = vector.broadcast %192 : vector<16x1xf32> to vector<16x32xf32>
    %194 = arith.mulf %184, %193 : vector<16x32xf32>
    %195 = vector.broadcast %176 : vector<1x32xf32> to vector<16x32xf32>
    %196 = arith.mulf %194, %195 : vector<16x32xf32>
    %197 = vector.broadcast %178 : vector<1x32xf32> to vector<16x32xf32>
    %198 = arith.addf %196, %197 : vector<16x32xf32>
    %199 = arith.truncf %198 : vector<16x32xf32> to vector<16x32xbf16>
    %cst_110 = arith.constant 0.000000e+00 : f32
    %200 = vector.broadcast %cst_110 : f32 to vector<16x32xf32>
    %c6 = arith.constant 6 : index
    %c0_111 = arith.constant 0 : index
    %c0_112 = arith.constant 0 : index
    %201 = vector.load %arg5[%c6, %c0_111, %c0_112] : memref<12x32x16xbf16, #tpu.memory_space<vmem>>, vector<1x32x16xbf16>
    %202 = vector.shape_cast %201 : vector<1x32x16xbf16> to vector<32x16xbf16>
    %cst_113 = arith.constant dense<0.000000e+00> : vector<16x16xf32>
    %203 = tpu.matmul %199, %202, %cst_113 {dimension_numbers = #tpu.dot_dimension_numbers<[1], [0], [0], [1], [0, 0, 1, 1], [], []>} : vector<16x32xbf16>, vector<32x16xbf16>, vector<16x16xf32> -> vector<16x16xf32>
    %c6_114 = arith.constant 6 : index
    %c0_115 = arith.constant 0 : index
    %c0_116 = arith.constant 0 : index
    %204 = vector.load %arg6[%c6_114, %c0_115, %c0_116] : memref<12x1x16xf32, #tpu.memory_space<vmem>>, vector<1x1x16xf32>
    %205 = vector.shape_cast %204 : vector<1x1x16xf32> to vector<1x16xf32>
    %206 = vector.broadcast %205 : vector<1x16xf32> to vector<16x16xf32>
    %207 = arith.addf %203, %206 : vector<16x16xf32>
    %cst_117 = arith.constant 2.500000e-01 : f32
    %208 = vector.broadcast %cst_117 : f32 to vector<16x16xf32>
    %209 = arith.mulf %207, %208 : vector<16x16xf32>
    %c8 = arith.constant 8 : index
    %c0_118 = arith.constant 0 : index
    %c0_119 = arith.constant 0 : index
    %210 = vector.load %arg5[%c8, %c0_118, %c0_119] : memref<12x32x16xbf16, #tpu.memory_space<vmem>>, vector<1x32x16xbf16>
    %211 = vector.shape_cast %210 : vector<1x32x16xbf16> to vector<32x16xbf16>
    %cst_120 = arith.constant dense<0.000000e+00> : vector<16x16xf32>
    %212 = tpu.matmul %199, %211, %cst_120 {dimension_numbers = #tpu.dot_dimension_numbers<[1], [0], [0], [1], [0, 0, 1, 1], [], []>} : vector<16x32xbf16>, vector<32x16xbf16>, vector<16x16xf32> -> vector<16x16xf32>
    %c8_121 = arith.constant 8 : index
    %c0_122 = arith.constant 0 : index
    %c0_123 = arith.constant 0 : index
    %213 = vector.load %arg6[%c8_121, %c0_122, %c0_123] : memref<12x1x16xf32, #tpu.memory_space<vmem>>, vector<1x1x16xf32>
    %214 = vector.shape_cast %213 : vector<1x1x16xf32> to vector<1x16xf32>
    %215 = vector.broadcast %214 : vector<1x16xf32> to vector<16x16xf32>
    %216 = arith.addf %212, %215 : vector<16x16xf32>
    %c10 = arith.constant 10 : index
    %c0_124 = arith.constant 0 : index
    %c0_125 = arith.constant 0 : index
    %217 = vector.load %arg5[%c10, %c0_124, %c0_125] : memref<12x32x16xbf16, #tpu.memory_space<vmem>>, vector<1x32x16xbf16>
    %218 = vector.shape_cast %217 : vector<1x32x16xbf16> to vector<32x16xbf16>
    %cst_126 = arith.constant dense<0.000000e+00> : vector<16x16xf32>
    %219 = tpu.matmul %199, %218, %cst_126 {dimension_numbers = #tpu.dot_dimension_numbers<[1], [0], [0], [1], [0, 0, 1, 1], [], []>} : vector<16x32xbf16>, vector<32x16xbf16>, vector<16x16xf32> -> vector<16x16xf32>
    %c10_127 = arith.constant 10 : index
    %c0_128 = arith.constant 0 : index
    %c0_129 = arith.constant 0 : index
    %220 = vector.load %arg6[%c10_127, %c0_128, %c0_129] : memref<12x1x16xf32, #tpu.memory_space<vmem>>, vector<1x1x16xf32>
    %221 = vector.shape_cast %220 : vector<1x1x16xf32> to vector<1x16xf32>
    %222 = vector.broadcast %221 : vector<1x16xf32> to vector<16x16xf32>
    %223 = arith.addf %219, %222 : vector<16x16xf32>
    %224 = arith.truncf %209 : vector<16x16xf32> to vector<16x16xbf16>
    %225 = arith.truncf %216 : vector<16x16xf32> to vector<16x16xbf16>
    %cst_130 = arith.constant dense<0.000000e+00> : vector<16x16xf32>
    %226 = tpu.matmul %224, %225, %cst_130 {dimension_numbers = #tpu.dot_dimension_numbers<[1], [1], [0], [0], [0, 0, 1, 0], [], []>} : vector<16x16xbf16>, vector<16x16xbf16>, vector<16x16xf32> -> vector<16x16xf32>
    %227 = arith.addf %226, %0 : vector<16x16xf32>
    %cst_131 = arith.constant dense<0xFF800000> : vector<16xf32>
    %228 = vector.multi_reduction <maximumf>, %227, %cst_131 [1] : vector<16x16xf32> to vector<16xf32>
    %229 = vector.shape_cast %228 : vector<16xf32> to vector<16x1xf32>
    %230 = vector.broadcast %229 : vector<16x1xf32> to vector<16x16xf32>
    %231 = arith.subf %227, %230 : vector<16x16xf32>
    %232 = math.exp %231 : vector<16x16xf32>
    %cst_132 = arith.constant dense<0.000000e+00> : vector<16xf32>
    %233 = vector.multi_reduction <add>, %232, %cst_132 [1] : vector<16x16xf32> to vector<16xf32>
    %234 = vector.shape_cast %233 : vector<16xf32> to vector<16x1xf32>
    %235 = tpu.reciprocal %234 {approx = true} : vector<16x1xf32> -> vector<16x1xf32>
    %236 = arith.truncf %232 : vector<16x16xf32> to vector<16x16xbf16>
    %237 = arith.truncf %223 : vector<16x16xf32> to vector<16x16xbf16>
    %cst_133 = arith.constant dense<0.000000e+00> : vector<16x16xf32>
    %238 = tpu.matmul %236, %237, %cst_133 {dimension_numbers = #tpu.dot_dimension_numbers<[1], [0], [0], [1], [0, 0, 1, 1], [], []>} : vector<16x16xbf16>, vector<16x16xbf16>, vector<16x16xf32> -> vector<16x16xf32>
    %239 = vector.broadcast %235 : vector<16x1xf32> to vector<16x16xf32>
    %240 = arith.mulf %238, %239 : vector<16x16xf32>
    %241 = arith.truncf %240 : vector<16x16xf32> to vector<16x16xbf16>
    %c2_134 = arith.constant 2 : index
    %c0_135 = arith.constant 0 : index
    %c0_136 = arith.constant 0 : index
    %242 = vector.load %arg7[%c2_134, %c0_135, %c0_136] : memref<4x16x32xbf16, #tpu.memory_space<vmem>>, vector<1x16x32xbf16>
    %243 = vector.shape_cast %242 : vector<1x16x32xbf16> to vector<16x32xbf16>
    %cst_137 = arith.constant dense<0.000000e+00> : vector<16x32xf32>
    %244 = tpu.matmul %241, %243, %cst_137 {dimension_numbers = #tpu.dot_dimension_numbers<[1], [0], [0], [1], [0, 0, 1, 1], [], []>} : vector<16x16xbf16>, vector<16x32xbf16>, vector<16x32xf32> -> vector<16x32xf32>
    %245 = arith.addf %200, %244 : vector<16x32xf32>
    %c7 = arith.constant 7 : index
    %c0_138 = arith.constant 0 : index
    %c0_139 = arith.constant 0 : index
    %246 = vector.load %arg5[%c7, %c0_138, %c0_139] : memref<12x32x16xbf16, #tpu.memory_space<vmem>>, vector<1x32x16xbf16>
    %247 = vector.shape_cast %246 : vector<1x32x16xbf16> to vector<32x16xbf16>
    %cst_140 = arith.constant dense<0.000000e+00> : vector<16x16xf32>
    %248 = tpu.matmul %199, %247, %cst_140 {dimension_numbers = #tpu.dot_dimension_numbers<[1], [0], [0], [1], [0, 0, 1, 1], [], []>} : vector<16x32xbf16>, vector<32x16xbf16>, vector<16x16xf32> -> vector<16x16xf32>
    %c7_141 = arith.constant 7 : index
    %c0_142 = arith.constant 0 : index
    %c0_143 = arith.constant 0 : index
    %249 = vector.load %arg6[%c7_141, %c0_142, %c0_143] : memref<12x1x16xf32, #tpu.memory_space<vmem>>, vector<1x1x16xf32>
    %250 = vector.shape_cast %249 : vector<1x1x16xf32> to vector<1x16xf32>
    %251 = vector.broadcast %250 : vector<1x16xf32> to vector<16x16xf32>
    %252 = arith.addf %248, %251 : vector<16x16xf32>
    %cst_144 = arith.constant 2.500000e-01 : f32
    %253 = vector.broadcast %cst_144 : f32 to vector<16x16xf32>
    %254 = arith.mulf %252, %253 : vector<16x16xf32>
    %c9 = arith.constant 9 : index
    %c0_145 = arith.constant 0 : index
    %c0_146 = arith.constant 0 : index
    %255 = vector.load %arg5[%c9, %c0_145, %c0_146] : memref<12x32x16xbf16, #tpu.memory_space<vmem>>, vector<1x32x16xbf16>
    %256 = vector.shape_cast %255 : vector<1x32x16xbf16> to vector<32x16xbf16>
    %cst_147 = arith.constant dense<0.000000e+00> : vector<16x16xf32>
    %257 = tpu.matmul %199, %256, %cst_147 {dimension_numbers = #tpu.dot_dimension_numbers<[1], [0], [0], [1], [0, 0, 1, 1], [], []>} : vector<16x32xbf16>, vector<32x16xbf16>, vector<16x16xf32> -> vector<16x16xf32>
    %c9_148 = arith.constant 9 : index
    %c0_149 = arith.constant 0 : index
    %c0_150 = arith.constant 0 : index
    %258 = vector.load %arg6[%c9_148, %c0_149, %c0_150] : memref<12x1x16xf32, #tpu.memory_space<vmem>>, vector<1x1x16xf32>
    %259 = vector.shape_cast %258 : vector<1x1x16xf32> to vector<1x16xf32>
    %260 = vector.broadcast %259 : vector<1x16xf32> to vector<16x16xf32>
    %261 = arith.addf %257, %260 : vector<16x16xf32>
    %c11 = arith.constant 11 : index
    %c0_151 = arith.constant 0 : index
    %c0_152 = arith.constant 0 : index
    %262 = vector.load %arg5[%c11, %c0_151, %c0_152] : memref<12x32x16xbf16, #tpu.memory_space<vmem>>, vector<1x32x16xbf16>
    %263 = vector.shape_cast %262 : vector<1x32x16xbf16> to vector<32x16xbf16>
    %cst_153 = arith.constant dense<0.000000e+00> : vector<16x16xf32>
    %264 = tpu.matmul %199, %263, %cst_153 {dimension_numbers = #tpu.dot_dimension_numbers<[1], [0], [0], [1], [0, 0, 1, 1], [], []>} : vector<16x32xbf16>, vector<32x16xbf16>, vector<16x16xf32> -> vector<16x16xf32>
    %c11_154 = arith.constant 11 : index
    %c0_155 = arith.constant 0 : index
    %c0_156 = arith.constant 0 : index
    %265 = vector.load %arg6[%c11_154, %c0_155, %c0_156] : memref<12x1x16xf32, #tpu.memory_space<vmem>>, vector<1x1x16xf32>
    %266 = vector.shape_cast %265 : vector<1x1x16xf32> to vector<1x16xf32>
    %267 = vector.broadcast %266 : vector<1x16xf32> to vector<16x16xf32>
    %268 = arith.addf %264, %267 : vector<16x16xf32>
    %269 = arith.truncf %254 : vector<16x16xf32> to vector<16x16xbf16>
    %270 = arith.truncf %261 : vector<16x16xf32> to vector<16x16xbf16>
    %cst_157 = arith.constant dense<0.000000e+00> : vector<16x16xf32>
    %271 = tpu.matmul %269, %270, %cst_157 {dimension_numbers = #tpu.dot_dimension_numbers<[1], [1], [0], [0], [0, 0, 1, 0], [], []>} : vector<16x16xbf16>, vector<16x16xbf16>, vector<16x16xf32> -> vector<16x16xf32>
    %272 = arith.addf %271, %0 : vector<16x16xf32>
    %cst_158 = arith.constant dense<0xFF800000> : vector<16xf32>
    %273 = vector.multi_reduction <maximumf>, %272, %cst_158 [1] : vector<16x16xf32> to vector<16xf32>
    %274 = vector.shape_cast %273 : vector<16xf32> to vector<16x1xf32>
    %275 = vector.broadcast %274 : vector<16x1xf32> to vector<16x16xf32>
    %276 = arith.subf %272, %275 : vector<16x16xf32>
    %277 = math.exp %276 : vector<16x16xf32>
    %cst_159 = arith.constant dense<0.000000e+00> : vector<16xf32>
    %278 = vector.multi_reduction <add>, %277, %cst_159 [1] : vector<16x16xf32> to vector<16xf32>
    %279 = vector.shape_cast %278 : vector<16xf32> to vector<16x1xf32>
    %280 = tpu.reciprocal %279 {approx = true} : vector<16x1xf32> -> vector<16x1xf32>
    %281 = arith.truncf %277 : vector<16x16xf32> to vector<16x16xbf16>
    %282 = arith.truncf %268 : vector<16x16xf32> to vector<16x16xbf16>
    %cst_160 = arith.constant dense<0.000000e+00> : vector<16x16xf32>
    %283 = tpu.matmul %281, %282, %cst_160 {dimension_numbers = #tpu.dot_dimension_numbers<[1], [0], [0], [1], [0, 0, 1, 1], [], []>} : vector<16x16xbf16>, vector<16x16xbf16>, vector<16x16xf32> -> vector<16x16xf32>
    %284 = vector.broadcast %280 : vector<16x1xf32> to vector<16x16xf32>
    %285 = arith.mulf %283, %284 : vector<16x16xf32>
    %286 = arith.truncf %285 : vector<16x16xf32> to vector<16x16xbf16>
    %c3_161 = arith.constant 3 : index
    %c0_162 = arith.constant 0 : index
    %c0_163 = arith.constant 0 : index
    %287 = vector.load %arg7[%c3_161, %c0_162, %c0_163] : memref<4x16x32xbf16, #tpu.memory_space<vmem>>, vector<1x16x32xbf16>
    %288 = vector.shape_cast %287 : vector<1x16x32xbf16> to vector<16x32xbf16>
    %cst_164 = arith.constant dense<0.000000e+00> : vector<16x32xf32>
    %289 = tpu.matmul %286, %288, %cst_164 {dimension_numbers = #tpu.dot_dimension_numbers<[1], [0], [0], [1], [0, 0, 1, 1], [], []>} : vector<16x16xbf16>, vector<16x32xbf16>, vector<16x32xf32> -> vector<16x32xf32>
    %290 = arith.addf %245, %289 : vector<16x32xf32>
    %c1_165 = arith.constant 1 : index
    %c0_166 = arith.constant 0 : index
    %c0_167 = arith.constant 0 : index
    %291 = vector.load %arg8[%c1_165, %c0_166, %c0_167] : memref<2x1x32xf32, #tpu.memory_space<vmem>>, vector<1x1x32xf32>
    %292 = vector.shape_cast %291 : vector<1x1x32xf32> to vector<1x32xf32>
    %293 = vector.broadcast %292 : vector<1x32xf32> to vector<16x32xf32>
    %294 = arith.addf %290, %293 : vector<16x32xf32>
    %295 = arith.addf %294, %198 : vector<16x32xf32>
    %c1_168 = arith.constant 1 : index
    %c0_169 = arith.constant 0 : index
    %c0_170 = arith.constant 0 : index
    %296 = vector.load %arg9[%c1_168, %c0_169, %c0_170] : memref<2x1x32xf32, #tpu.memory_space<vmem>>, vector<1x1x32xf32>
    %297 = vector.shape_cast %296 : vector<1x1x32xf32> to vector<1x32xf32>
    %c1_171 = arith.constant 1 : index
    %c0_172 = arith.constant 0 : index
    %c0_173 = arith.constant 0 : index
    %298 = vector.load %arg10[%c1_171, %c0_172, %c0_173] : memref<2x1x32xf32, #tpu.memory_space<vmem>>, vector<1x1x32xf32>
    %299 = vector.shape_cast %298 : vector<1x1x32xf32> to vector<1x32xf32>
    %cst_174 = arith.constant dense<0.000000e+00> : vector<16xf32>
    %300 = vector.multi_reduction <add>, %295, %cst_174 [1] : vector<16x32xf32> to vector<16xf32>
    %301 = vector.shape_cast %300 : vector<16xf32> to vector<16x1xf32>
    %cst_175 = arith.constant 3.200000e+01 : f32
    %302 = vector.broadcast %cst_175 : f32 to vector<16x1xf32>
    %303 = arith.divf %301, %302 : vector<16x1xf32>
    %304 = vector.broadcast %303 : vector<16x1xf32> to vector<16x32xf32>
    %305 = arith.subf %295, %304 : vector<16x32xf32>
    %306 = arith.mulf %305, %305 : vector<16x32xf32>
    %cst_176 = arith.constant dense<0.000000e+00> : vector<16xf32>
    %307 = vector.multi_reduction <add>, %306, %cst_176 [1] : vector<16x32xf32> to vector<16xf32>
    %308 = vector.shape_cast %307 : vector<16xf32> to vector<16x1xf32>
    %cst_177 = arith.constant 3.200000e+01 : f32
    %309 = vector.broadcast %cst_177 : f32 to vector<16x1xf32>
    %310 = arith.divf %308, %309 : vector<16x1xf32>
    %cst_178 = arith.constant 9.99999974E-6 : f32
    %311 = vector.broadcast %cst_178 : f32 to vector<16x1xf32>
    %312 = arith.addf %310, %311 : vector<16x1xf32>
    %313 = math.rsqrt %312 : vector<16x1xf32>
    %314 = vector.broadcast %313 : vector<16x1xf32> to vector<16x32xf32>
    %315 = arith.mulf %305, %314 : vector<16x32xf32>
    %316 = vector.broadcast %297 : vector<1x32xf32> to vector<16x32xf32>
    %317 = arith.mulf %315, %316 : vector<16x32xf32>
    %318 = vector.broadcast %299 : vector<1x32xf32> to vector<16x32xf32>
    %319 = arith.addf %317, %318 : vector<16x32xf32>
    %320 = arith.truncf %319 : vector<16x32xf32> to vector<16x32xbf16>
    %c1_179 = arith.constant 1 : index
    %c0_180 = arith.constant 0 : index
    %c0_181 = arith.constant 0 : index
    %321 = vector.load %arg11[%c1_179, %c0_180, %c0_181] : memref<2x32x64xbf16, #tpu.memory_space<vmem>>, vector<1x32x64xbf16>
    %322 = vector.shape_cast %321 : vector<1x32x64xbf16> to vector<32x64xbf16>
    %cst_182 = arith.constant dense<0.000000e+00> : vector<16x64xf32>
    %323 = tpu.matmul %320, %322, %cst_182 {dimension_numbers = #tpu.dot_dimension_numbers<[1], [0], [0], [1], [0, 0, 1, 1], [], []>} : vector<16x32xbf16>, vector<32x64xbf16>, vector<16x64xf32> -> vector<16x64xf32>
    %c1_183 = arith.constant 1 : index
    %c0_184 = arith.constant 0 : index
    %c0_185 = arith.constant 0 : index
    %324 = vector.load %arg12[%c1_183, %c0_184, %c0_185] : memref<2x1x64xf32, #tpu.memory_space<vmem>>, vector<1x1x64xf32>
    %325 = vector.shape_cast %324 : vector<1x1x64xf32> to vector<1x64xf32>
    %326 = vector.broadcast %325 : vector<1x64xf32> to vector<16x64xf32>
    %327 = arith.addf %323, %326 : vector<16x64xf32>
    %cst_186 = arith.constant 5.000000e-01 : f32
    %328 = vector.broadcast %cst_186 : f32 to vector<16x64xf32>
    %329 = arith.mulf %328, %327 : vector<16x64xf32>
    %cst_187 = arith.constant 4.471500e-02 : f32
    %330 = vector.broadcast %cst_187 : f32 to vector<16x64xf32>
    %331 = arith.mulf %330, %327 : vector<16x64xf32>
    %332 = arith.mulf %331, %327 : vector<16x64xf32>
    %333 = arith.mulf %332, %327 : vector<16x64xf32>
    %334 = arith.addf %327, %333 : vector<16x64xf32>
    %cst_188 = arith.constant 0.797884583 : f32
    %335 = vector.broadcast %cst_188 : f32 to vector<16x64xf32>
    %336 = arith.mulf %335, %334 : vector<16x64xf32>
    %337 = math.tanh %336 : vector<16x64xf32>
    %cst_189 = arith.constant 1.000000e+00 : f32
    %338 = vector.broadcast %cst_189 : f32 to vector<16x64xf32>
    %339 = arith.addf %338, %337 : vector<16x64xf32>
    %340 = arith.mulf %329, %339 : vector<16x64xf32>
    %341 = arith.truncf %340 : vector<16x64xf32> to vector<16x64xbf16>
    %c1_190 = arith.constant 1 : index
    %c0_191 = arith.constant 0 : index
    %c0_192 = arith.constant 0 : index
    %342 = vector.load %arg13[%c1_190, %c0_191, %c0_192] : memref<2x64x32xbf16, #tpu.memory_space<vmem>>, vector<1x64x32xbf16>
    %343 = vector.shape_cast %342 : vector<1x64x32xbf16> to vector<64x32xbf16>
    %cst_193 = arith.constant dense<0.000000e+00> : vector<16x32xf32>
    %344 = tpu.matmul %341, %343, %cst_193 {dimension_numbers = #tpu.dot_dimension_numbers<[1], [0], [0], [1], [0, 0, 1, 1], [], []>} : vector<16x64xbf16>, vector<64x32xbf16>, vector<16x32xf32> -> vector<16x32xf32>
    %c1_194 = arith.constant 1 : index
    %c0_195 = arith.constant 0 : index
    %c0_196 = arith.constant 0 : index
    %345 = vector.load %arg14[%c1_194, %c0_195, %c0_196] : memref<2x1x32xf32, #tpu.memory_space<vmem>>, vector<1x1x32xf32>
    %346 = vector.shape_cast %345 : vector<1x1x32xf32> to vector<1x32xf32>
    %347 = vector.broadcast %346 : vector<1x32xf32> to vector<16x32xf32>
    %348 = arith.addf %344, %347 : vector<16x32xf32>
    %349 = arith.addf %348, %319 : vector<16x32xf32>
    %c1_197 = arith.constant 1 : index
    %c0_198 = arith.constant 0 : index
    %c0_199 = arith.constant 0 : index
    %350 = vector.load %arg15[%c1_197, %c0_198, %c0_199] : memref<2x1x32xf32, #tpu.memory_space<vmem>>, vector<1x1x32xf32>
    %351 = vector.shape_cast %350 : vector<1x1x32xf32> to vector<1x32xf32>
    %c1_200 = arith.constant 1 : index
    %c0_201 = arith.constant 0 : index
    %c0_202 = arith.constant 0 : index
    %352 = vector.load %arg16[%c1_200, %c0_201, %c0_202] : memref<2x1x32xf32, #tpu.memory_space<vmem>>, vector<1x1x32xf32>
    %353 = vector.shape_cast %352 : vector<1x1x32xf32> to vector<1x32xf32>
    %cst_203 = arith.constant dense<0.000000e+00> : vector<16xf32>
    %354 = vector.multi_reduction <add>, %349, %cst_203 [1] : vector<16x32xf32> to vector<16xf32>
    %355 = vector.shape_cast %354 : vector<16xf32> to vector<16x1xf32>
    %cst_204 = arith.constant 3.200000e+01 : f32
    %356 = vector.broadcast %cst_204 : f32 to vector<16x1xf32>
    %357 = arith.divf %355, %356 : vector<16x1xf32>
    %358 = vector.broadcast %357 : vector<16x1xf32> to vector<16x32xf32>
    %359 = arith.subf %349, %358 : vector<16x32xf32>
    %360 = arith.mulf %359, %359 : vector<16x32xf32>
    %cst_205 = arith.constant dense<0.000000e+00> : vector<16xf32>
    %361 = vector.multi_reduction <add>, %360, %cst_205 [1] : vector<16x32xf32> to vector<16xf32>
    %362 = vector.shape_cast %361 : vector<16xf32> to vector<16x1xf32>
    %cst_206 = arith.constant 3.200000e+01 : f32
    %363 = vector.broadcast %cst_206 : f32 to vector<16x1xf32>
    %364 = arith.divf %362, %363 : vector<16x1xf32>
    %cst_207 = arith.constant 9.99999974E-6 : f32
    %365 = vector.broadcast %cst_207 : f32 to vector<16x1xf32>
    %366 = arith.addf %364, %365 : vector<16x1xf32>
    %367 = math.rsqrt %366 : vector<16x1xf32>
    %368 = vector.broadcast %367 : vector<16x1xf32> to vector<16x32xf32>
    %369 = arith.mulf %359, %368 : vector<16x32xf32>
    %370 = vector.broadcast %351 : vector<1x32xf32> to vector<16x32xf32>
    %371 = arith.mulf %369, %370 : vector<16x32xf32>
    %372 = vector.broadcast %353 : vector<1x32xf32> to vector<16x32xf32>
    %373 = arith.addf %371, %372 : vector<16x32xf32>
    %374 = vector.extract_strided_slice %373 {offsets = [0, 0], sizes = [1, 32], strides = [1, 1]} : vector<16x32xf32> to vector<1x32xf32>
    %375 = vector.extract_strided_slice %373 {offsets = [8, 0], sizes = [1, 32], strides = [1, 1]} : vector<16x32xf32> to vector<1x32xf32>
    %376 = tpu.concatenate %374, %375 in 0 : vector<1x32xf32>, vector<1x32xf32> -> vector<2x32xf32>
    %377 = arith.truncf %376 : vector<2x32xf32> to vector<2x32xbf16>
    %c0_208 = arith.constant 0 : index
    %c0_209 = arith.constant 0 : index
    %378 = vector.load %arg17[%c0_208, %c0_209] : memref<32x32xbf16, #tpu.memory_space<vmem>>, vector<32x32xbf16>
    %cst_210 = arith.constant dense<0.000000e+00> : vector<2x32xf32>
    %379 = tpu.matmul %377, %378, %cst_210 {dimension_numbers = #tpu.dot_dimension_numbers<[1], [0], [0], [1], [0, 0, 1, 1], [], []>} : vector<2x32xbf16>, vector<32x32xbf16>, vector<2x32xf32> -> vector<2x32xf32>
    %c0_211 = arith.constant 0 : index
    %c0_212 = arith.constant 0 : index
    %380 = vector.load %arg18[%c0_211, %c0_212] : memref<1x32xf32, #tpu.memory_space<vmem>>, vector<1x32xf32>
    %381 = vector.broadcast %380 : vector<1x32xf32> to vector<2x32xf32>
    %382 = arith.addf %379, %381 : vector<2x32xf32>
    %383 = math.tanh %382 : vector<2x32xf32>
    %384 = arith.truncf %383 : vector<2x32xf32> to vector<2x32xbf16>
    %c0_213 = arith.constant 0 : index
    %c0_214 = arith.constant 0 : index
    %385 = vector.load %arg19[%c0_213, %c0_214] : memref<32x2xbf16, #tpu.memory_space<vmem>>, vector<32x2xbf16>
    %cst_215 = arith.constant dense<0.000000e+00> : vector<2x2xf32>
    %386 = tpu.matmul %384, %385, %cst_215 {dimension_numbers = #tpu.dot_dimension_numbers<[1], [0], [0], [1], [0, 0, 1, 1], [], []>} : vector<2x32xbf16>, vector<32x2xbf16>, vector<2x2xf32> -> vector<2x2xf32>
    %c0_216 = arith.constant 0 : index
    %c0_217 = arith.constant 0 : index
    %387 = vector.load %arg20[%c0_216, %c0_217] : memref<1x2xf32, #tpu.memory_space<vmem>>, vector<1x2xf32>
    %388 = vector.broadcast %387 : vector<1x2xf32> to vector<2x2xf32>
    %389 = arith.addf %386, %388 : vector<2x2xf32>
    %c0_218 = arith.constant 0 : index
    %c0_219 = arith.constant 0 : index
    %390 = vector.load %arg21[%c0_218, %c0_219] : memref<2x2xf32, #tpu.memory_space<vmem>>, vector<2x2xf32>
    tpu.vector_store %arg21[%c0_218, %c0_219], %389 {strides = array<i32>} : memref<2x2xf32, #tpu.memory_space<vmem>>, vector<2x2xf32>,
    return
  }
  func.func @transform_0(%arg0: i32) -> (i32, i32) {
    %c0_i32 = arith.constant 0 : i32
    %c0_i32_0 = arith.constant 0 : i32
    %c0_i32_1 = arith.constant 0 : i32
    return %c0_i32, %c0_i32_0 : i32, i32
  }
  func.func @transform_1(%arg0: i32) -> (i32, i32) {
    %c0_i32 = arith.constant 0 : i32
    %c0_i32_0 = arith.constant 0 : i32
    %c0_i32_1 = arith.constant 0 : i32
    return %c0_i32, %c0_i32_0 : i32, i32
  }
  func.func @transform_2(%arg0: i32) -> (i32, i32) {
    %c0_i32 = arith.constant 0 : i32
    %c0_i32_0 = arith.constant 0 : i32
    %c0_i32_1 = arith.constant 0 : i32
    return %c0_i32, %c0_i32_0 : i32, i32
  }
  func.func @transform_3(%arg0: i32) -> (i32, i32) {
    %c0_i32 = arith.constant 0 : i32
    %c0_i32_0 = arith.constant 0 : i32
    %c0_i32_1 = arith.constant 0 : i32
    return %c0_i32, %c0_i32_0 : i32, i32
  }
  func.func @transform_4(%arg0: i32) -> (i32, i32, i32) {
    %c0_i32 = arith.constant 0 : i32
    %c0_i32_0 = arith.constant 0 : i32
    %c0_i32_1 = arith.constant 0 : i32
    %c0_i32_2 = arith.constant 0 : i32
    return %c0_i32, %c0_i32_0, %c0_i32_1 : i32, i32, i32
  }
  func.func @transform_5(%arg0: i32) -> (i32, i32, i32) {
    %c0_i32 = arith.constant 0 : i32
    %c0_i32_0 = arith.constant 0 : i32
    %c0_i32_1 = arith.constant 0 : i32
    %c0_i32_2 = arith.constant 0 : i32
    return %c0_i32, %c0_i32_0, %c0_i32_1 : i32, i32, i32
  }
  func.func @transform_6(%arg0: i32) -> (i32, i32, i32) {
    %c0_i32 = arith.constant 0 : i32
    %c0_i32_0 = arith.constant 0 : i32
    %c0_i32_1 = arith.constant 0 : i32
    %c0_i32_2 = arith.constant 0 : i32
    return %c0_i32, %c0_i32_0, %c0_i32_1 : i32, i32, i32
  }
  func.func @transform_7(%arg0: i32) -> (i32, i32, i32) {
    %c0_i32 = arith.constant 0 : i32
    %c0_i32_0 = arith.constant 0 : i32
    %c0_i32_1 = arith.constant 0 : i32
    %c0_i32_2 = arith.constant 0 : i32
    return %c0_i32, %c0_i32_0, %c0_i32_1 : i32, i32, i32
  }
  func.func @transform_8(%arg0: i32) -> (i32, i32, i32) {
    %c0_i32 = arith.constant 0 : i32
    %c0_i32_0 = arith.constant 0 : i32
    %c0_i32_1 = arith.constant 0 : i32
    %c0_i32_2 = arith.constant 0 : i32
    return %c0_i32, %c0_i32_0, %c0_i32_1 : i32, i32, i32
  }
  func.func @transform_9(%arg0: i32) -> (i32, i32, i32) {
    %c0_i32 = arith.constant 0 : i32
    %c0_i32_0 = arith.constant 0 : i32
    %c0_i32_1 = arith.constant 0 : i32
    %c0_i32_2 = arith.constant 0 : i32
    return %c0_i32, %c0_i32_0, %c0_i32_1 : i32, i32, i32
  }
  func.func @transform_10(%arg0: i32) -> (i32, i32, i32) {
    %c0_i32 = arith.constant 0 : i32
    %c0_i32_0 = arith.constant 0 : i32
    %c0_i32_1 = arith.constant 0 : i32
    %c0_i32_2 = arith.constant 0 : i32
    return %c0_i32, %c0_i32_0, %c0_i32_1 : i32, i32, i32
  }
  func.func @transform_11(%arg0: i32) -> (i32, i32, i32) {
    %c0_i32 = arith.constant 0 : i32
    %c0_i32_0 = arith.constant 0 : i32
    %c0_i32_1 = arith.constant 0 : i32
    %c0_i32_2 = arith.constant 0 : i32
    return %c0_i32, %c0_i32_0, %c0_i32_1 : i32, i32, i32
  }
  func.func @transform_12(%arg0: i32) -> (i32, i32, i32) {
    %c0_i32 = arith.constant 0 : i32
    %c0_i32_0 = arith.constant 0 : i32
    %c0_i32_1 = arith.constant 0 : i32
    %c0_i32_2 = arith.constant 0 : i32
    return %c0_i32, %c0_i32_0, %c0_i32_1 : i32, i32, i32
  }
  func.func @transform_13(%arg0: i32) -> (i32, i32, i32) {
    %c0_i32 = arith.constant 0 : i32
    %c0_i32_0 = arith.constant 0 : i32
    %c0_i32_1 = arith.constant 0 : i32
    %c0_i32_2 = arith.constant 0 : i32
    return %c0_i32, %c0_i32_0, %c0_i32_1 : i32, i32, i32
  }
  func.func @transform_14(%arg0: i32) -> (i32, i32, i32) {
    %c0_i32 = arith.constant 0 : i32
    %c0_i32_0 = arith.constant 0 : i32
    %c0_i32_1 = arith.constant 0 : i32
    %c0_i32_2 = arith.constant 0 : i32
    return %c0_i32, %c0_i32_0, %c0_i32_1 : i32, i32, i32
  }
  func.func @transform_15(%arg0: i32) -> (i32, i32, i32) {
    %c0_i32 = arith.constant 0 : i32
    %c0_i32_0 = arith.constant 0 : i32
    %c0_i32_1 = arith.constant 0 : i32
    %c0_i32_2 = arith.constant 0 : i32
    return %c0_i32, %c0_i32_0, %c0_i32_1 : i32, i32, i32
  }
  func.func @transform_16(%arg0: i32) -> (i32, i32) {
    %c0_i32 = arith.constant 0 : i32
    %c0_i32_0 = arith.constant 0 : i32
    %c0_i32_1 = arith.constant 0 : i32
    return %c0_i32, %c0_i32_0 : i32, i32
  }
  func.func @transform_17(%arg0: i32) -> (i32, i32) {
    %c0_i32 = arith.constant 0 : i32
    %c0_i32_0 = arith.constant 0 : i32
    %c0_i32_1 = arith.constant 0 : i32
    return %c0_i32, %c0_i32_0 : i32, i32
  }
  func.func @transform_18(%arg0: i32) -> (i32, i32) {
    %c0_i32 = arith.constant 0 : i32
    %c0_i32_0 = arith.constant 0 : i32
    %c0_i32_1 = arith.constant 0 : i32
    return %c0_i32, %c0_i32_0 : i32, i32
  }
  func.func @transform_19(%arg0: i32) -> (i32, i32) {
    %c0_i32 = arith.constant 0 : i32
    %c0_i32_0 = arith.constant 0 : i32
    %c0_i32_1 = arith.constant 0 : i32
    return %c0_i32, %c0_i32_0 : i32, i32
  }
  func.func @transform_20(%arg0: i32) -> (i32, i32) {
    %c0_i32 = arith.constant 0 : i32
    %c0_i32_0 = arith.constant 0 : i32
    %c0_i32_1 = arith.constant 0 : i32
    return %c0_i32, %c0_i32_0 : i32, i32
  }
}

</mosaic_0001>

<bundles_post_ra>
// kernel: mul.8
= control target key start
LH: loop header
LB: loop body
LE: loop exit
PB: predicated region body
PF: predicated region fallthrough
CT: control target
= control target key end

     0   :  { %vm7_vm0 = vcmask 64512   ;;  %vm13_vm1 = vcmask 130112   ;;  %s39_s0 = inlined_call_operand.vmem [shape: f32[2,8], index: 0, kind: input, shape index: {}]   ;;  %s40_s1 = inlined_call_operand.vmem [shape: f32[16], index: 1, kind: output, shape index: {}]  }
   0x1   :  { %v4_v0 = vld [vmem:[%s39_s0] sm:$0x3]  ;;  %s22_s0 = smov 8  }
   0x2   :  { %5 = vst [vmem:[#allocation1] sm:$0x3] %v4_v0 }
   0x9   :  { %v10_v1 = vld [vmem:[#allocation1 + $0x1] sm:$0x1]   ;;  %v6_v2 = vld [vmem:[#allocation1] sm:$0x1]  }
   0xa   :  { %11 = vrot.lane.b32.xlu0 %v10_v1, %s22_s0  ;;  %8 = vst.msk [vmem:[#allocation0] sm:$0x1] %vm7_vm0, %v6_v2  }
  0x7c   :  { %v12_v3 = vpop.permute.xlu0 %11  }
  0x7d   :  { %14 = vst.msk [vmem:[#allocation0] sm:$0x1] %vm13_vm1, %v12_v3  }
  0x84   :  { %v17_v4 = vld [vmem:[#allocation0] sm:$0x1] }
  0x85   :  { %20 = vst [vmem:[%s40_s1] sm:$0x1] %v17_v4 }

// kernel: cross_encoder_forward.1
= control target key start
LH: loop header
LB: loop body
LE: loop exit
PB: predicated region body
PF: predicated region fallthrough
CT: control target
= control target key end

     0   :  { %s2429_s0 = inlined_call_operand.vmem [shape: f32[16,32], index: 0, kind: input, shape index: {}]   ;;  %s2430_s1 = inlined_call_operand.vmem [shape: f32[16,16], index: 1, kind: input, shape index: {}]   ;;  %s2431_s2 = inlined_call_operand.vmem [shape: f32[1,32], index: 2, kind: input, shape index: {}]   ;;  %s2432_s3 = inlined_call_operand.vmem [shape: f32[1,32], index: 3, kind: input, shape index: {}]   ;;  %s2433_s4 = inlined_call_operand.vmem [shape: bf16[12,32,16], index: 4, kind: input, shape index: {}]   ;;  %s2434_s5 = inlined_call_operand.vmem [shape: f32[12,1,16], index: 5, kind: input, shape index: {}]   ;;  %s2435_s6 = inlined_call_operand.vmem [shape: bf16[4,16,32], index: 6, kind: input, shape index: {}]   ;;  %s2436_s7 = inlined_call_operand.vmem [shape: f32[2,1,32], index: 7, kind: input, shape index: {}]   ;;  %s2437_s8 = inlined_call_operand.vmem [shape: f32[2,1,32], index: 8, kind: input, shape index: {}]   ;;  %s2438_s9 = inlined_call_operand.vmem [shape: f32[2,1,32], index: 9, kind: input, shape index: {}]   ;;  %s2439_s10 = inlined_call_operand.vmem [shape: bf16[2,32,64], index: 10, kind: input, shape index: {}]   ;;  %s2440_s11 = inlined_call_operand.vmem [shape: f32[2,1,64], index: 11, kind: input, shape index: {}]   ;;  %s2441_s12 = inlined_call_operand.vmem [shape: bf16[2,64,32], index: 12, kind: input, shape index: {}]   ;;  %s2442_s13 = inlined_call_operand.vmem [shape: f32[2,1,32], index: 13, kind: input, shape index: {}]   ;;  %s2443_s14 = inlined_call_operand.vmem [shape: f32[2,1,32], index: 14, kind: input, shape index: {}]   ;;  %s2444_s15 = inlined_call_operand.vmem [shape: f32[2,1,32], index: 15, kind: input, shape index: {}]   ;;  %s2445_s16 = inlined_call_operand.vmem [shape: bf16[32,32], index: 16, kind: input, shape index: {}]   ;;  %s2446_s17 = inlined_call_operand.vmem [shape: f32[1,32], index: 17, kind: input, shape index: {}]   ;;  %s2447_s18 = inlined_call_operand.vmem [shape: bf16[32,2], index: 18, kind: input, shape index: {}]   ;;  %s2448_s19 = inlined_call_operand.vmem [shape: f32[1,2], index: 19, kind: input, shape index: {}]   ;;  %s2449_s20 = inlined_call_operand.hbm [shape: f32[2,2], index: 20, kind: output, shape index: {}]  }
   0x1   :  { %2453 = sst [smem:[#allocation5_spill]] %s2429_s0 }
   0x2   :  { %2454 = sst [smem:[#allocation6_spill]] %s2430_s1 }
   0x3   :  { %2455 = sst [smem:[#allocation7_spill]] %s2431_s2 }
   0x4   :  { %2456 = sst [smem:[#allocation8_spill]] %s2432_s3 }
   0x5   :  { %2457 = sst [smem:[#allocation9_spill]] %s2433_s4 }
   0x6   :  { %s2458_s23 = sld [smem:[#allocation5_spill]]  ;;  %vm73_vm0 = vcmask 261120  }
   0xc   :  { %v69_v0 = vld [vmem:[%s2458_s23] sm:$0xff]  ;;  %v70_v1 = vld [vmem:[%s2458_s23 + $0x8] sm:$0xff] }
   0xd   :  { %v74_v2 = vsel %vm73_vm0, %v69_v0, 0.0  ;;  %v77_v3 = vsel %vm73_vm0, %v70_v1, 0.0 }
   0xe   :  { %75 = vadd.xlane.f32.xlu0 %v74_v2 }
  0x16   :  { %78 = vadd.xlane.f32.xlu0 %v77_v3 }
  0x17   :  { %25 = vsyncpa [#allocation3], 0  ;;  %v1965_v4 = vmov 32.0   ;;  %s2459_s26 = sld [smem:[#allocation9_spill]]  ;;  %v1848_v62 = vld [vmem:[%s2434_s5 + $0x2] ss:$0 sm:$0xff] }
  0x18   :  { %1875 = vrcp.f32 %v1965_v4  ;;  %s2460_s21 = sld [smem:[#allocation7_spill]]  ;;  %v1847_v2 = vld [vmem:[%s2434_s5] ss:$0 sm:$0xff]  ;;  %vm249_vm8 = vcmask 130048   ;;  %vm694_vm15 = vcmask 523264  }
  0x19   :  { %s2461_s23 = sld [smem:[#allocation8_spill]] }
  0x1a   :  { %s2462_s24 = sld [smem:[#allocation6_spill]] }
  0x1d   :  { %v1800_v21 = vld [vmem:[%s2459_s26 + $0x8] sm:$0xff]  ;;  %v1799_v26 = vld [vmem:[%s2459_s26] sm:$0xff]  ;;  %v1807_v31 = vld [vmem:[%s2459_s26 + $0x18] sm:$0xff] }
  0x1e   :  { %v1876_v5 = vpop.eup %1875  ;;  %v1802_v22 = vld [vmem:[%s2459_s26 + $0x28] sm:$0xff]  ;;  %165 = vmatpush.bf16.msra.mxu0 %v1800_v21  ;;  %v1801_v27 = vld [vmem:[%s2459_s26 + $0x20] sm:$0xff]  ;;  %v1809_v32 = vld [vmem:[%s2459_s26 + $0x38] sm:$0xff] }
  0x1f   :  { %v81_v6 = vmul.f32 32.0, %v1876_v5  ;;  %vm85_vm1 = vweird.f32 %v1876_v5  ;;  %v1804_v23 = vld [vmem:[%s2459_s26 + $0x48] sm:$0xff]  ;;  %203 = vmatpush.bf16.msra.mxu1 %v1802_v22  ;;  %v1803_v28 = vld [vmem:[%s2459_s26 + $0x40] sm:$0xff]  ;;  %v1806_v34 = vld [vmem:[%s2459_s26 + $0x10] sm:$0xff] }
  0x20   :  { %239 = vmatpush.bf16.msra.mxu2 %v1804_v23  ;;  %v1808_v35 = vld [vmem:[%s2459_s26 + $0x30] sm:$0xff]  ;;  %v1845_v49 = vld [vmem:[%s2460_s21] ss:$0 sm:$0xff]  ;;  %v1851_v21 = vld [vmem:[%s2434_s5 + $0x3] ss:$0 sm:$0xff] }
  0x21   :  { %v82_v7 = vsub.f32 1.0, %v81_v6  ;;  %v1846_v53 = vld [vmem:[%s2461_s23] ss:$0 sm:$0xff] }
  0x22   :  { %166 = vmatpush.bf16.msra.mxu0 %v1799_v26 }
  0x23   :  { %v83_v8 = vmul.f32 %v1876_v5, %v82_v7  ;;  %204 = vmatpush.bf16.msra.mxu1 %v1801_v27  ;;  %v1811_v7 = vld [vmem:[%s2459_s26 + $0x58] sm:$0xff]  ;;  %v2160_v27 = vld [vmem:[%s2462_s24] sm:$0xff] }
  0x24   :  { %240 = vmatpush.bf16.msra.mxu2 %v1803_v28 }
  0x25   :  { %v84_v9 = vadd.f32 %v1876_v5, %v83_v8  ;;  %v1849_v8 = vld [vmem:[%s2434_s5 + $0x4] ss:$0 sm:$0xff] }
  0x27   :  { %v2080_v10 = vsel %vm85_vm1, %v1876_v5, %v84_v9  ;;  %342 = vmatpush.bf16.msrb.mxu1 %v1807_v31  ;;  %v2167_v31 = vld [vmem:[%s2462_s24 + $0x8] sm:$0xff]  ;;  %s1504_s24 = sshll.u32 %s2449_s20, 4  ;;  %s1505_s24 = int_to_ptr.hbm [resolvable:$true] %s1504_s24 }
  0x28   :  { %380 = vmatpush.bf16.msrb.mxu2 %v1809_v32 }
  0x2b   :  { %343 = vmatpush.bf16.msrb.mxu1 %v1806_v34 }
  0x2c   :  { %381 = vmatpush.bf16.msrb.mxu2 %v1808_v35 }
  0x81   :  { %v76_v11 = vpop.xlane.xlu0 %75 }
  0x82   :  { %v87_v12 = vmul.f32 %v2080_v10, %v76_v11 }
  0x84   :  { %v89_v13 = vsub.f32 %v69_v0, %v87_v12 }
  0x86   :  { %v91_v14 = vmul.f32 %v89_v13, %v89_v13 }
  0x88   :  { %v93_v15 = vsel %vm73_vm0, %v91_v14, 0.0  ;;  %v1810_v14 = vld [vmem:[%s2459_s26 + $0x50] sm:$0xff] }
  0x89   :  { %94 = vadd.xlane.f32.xlu1 %v93_v15  ;;  %v79_v16 = vpop.xlane.xlu0 %78 }
  0x8a   :  { %v88_v17 = vmul.f32 %v2080_v10, %v79_v16 }
  0x8c   :  { %v90_v18 = vsub.f32 %v70_v1, %v88_v17 }
  0x8e   :  { %v92_v19 = vmul.f32 %v90_v18, %v90_v18 }
  0x90   :  { %v96_v20 = vsel %vm73_vm0, %v92_v19, 0.0 }
  0x91   :  { %97 = vadd.xlane.f32.xlu1 %v96_v20 }
  0xfc   :  { %v95_v24 = vpop.xlane.xlu1 %94 }
  0xfd   :  { %v99_v25 = vmul.f32 %v95_v24, %v2080_v10 }
  0xff   :  { %v101_v29 = vadd.f32 1e-05, %v99_v25 }
 0x101   :  { %1877 = vrsqrt.f32 %v101_v29  ;;  %vm109_vm3 = vweird.f32 %v101_v29 }
 0x104   :  { %v98_v30 = vpop.xlane.xlu1 %97 }
 0x105   :  { %v100_v33 = vmul.f32 %v98_v30, %v2080_v10 }
 0x107   :  { %v1878_v36 = vpop.eup %1877  ;;  %v102_v37 = vadd.f32 1e-05, %v100_v33 }
 0x108   :  { %v104_v38 = vmul.f32 %v1878_v36, %v101_v29  ;;  %vm110_vm2 = vweird.f32 %v1878_v36 }
 0x109   :  { %1879 = vrsqrt.f32 %v102_v37  ;;  %vm111_vm4 = vmor %vm109_vm3, %vm110_vm2  ;;  %vm119_vm6 = vweird.f32 %v102_v37 }
 0x10a   :  { %v105_v39 = vmul.f32 %v1878_v36, %v104_v38 }
 0x10c   :  { %v106_v40 = vmul.f32 0.5, %v105_v39 }
 0x10e   :  { %v107_v41 = vsub.f32 1.5, %v106_v40 }
 0x10f   :  { %v1880_v42 = vpop.eup %1879 }
 0x110   :  { %v108_v43 = vmul.f32 %v1878_v36, %v107_v41  ;;  %v114_v44 = vmul.f32 %v1880_v42, %v102_v37  ;;  %vm120_vm5 = vweird.f32 %v1880_v42 }
 0x111   :  { %vm121_vm7 = vmor %vm119_vm6, %vm120_vm5 }
 0x112   :  { %v115_v45 = vmul.f32 %v1880_v42, %v114_v44  ;;  %v112_v46 = vsel %vm111_vm4, %v1878_v36, %v108_v43  ;;  %v1852_v36 = vld [vmem:[%s2434_s5 + $0x5] ss:$0 sm:$0xff] }
 0x113   :  { %v123_v50 = vmul.f32 %v112_v46, %v89_v13 }
 0x114   :  { %v116_v47 = vmul.f32 0.5, %v115_v45 }
 0x115   :  { %v128_v54 = vmul.f32 %v1845_v49, %v123_v50 }
 0x116   :  { %v117_v48 = vsub.f32 1.5, %v116_v47 }
 0x117   :  { %v2124_v57 = vadd.f32 %v1846_v53, %v128_v54 }
 0x118   :  { %v118_v51 = vmul.f32 %v1880_v42, %v117_v48 }
 0x11a   :  { %v122_v52 = vsel %vm121_vm7, %v1880_v42, %v118_v51 }
 0x11b   :  { %v124_v55 = vmul.f32 %v122_v52, %v90_v18 }
 0x11d   :  { %v129_v56 = vmul.f32 %v1845_v49, %v124_v55 }
 0x11f   :  { %v2126_v58 = vadd.f32 %v1846_v53, %v129_v56  ;;  %v1850_v53 = vld [vmem:[%s2434_s5 + $0x1] ss:$0 sm:$0xff] }
 0x121   :  { %v135_v59 = vpack.c.bf16 %v2126_v58, %v2124_v57 }
 0x123   :  { %1521 = vmatmul.msk.bf16.vlgmr.msra.gmra.mxu0 %vm73_vm0, %v135_v59  ;;  %1535 = vmatmul.msk.bf16.vlgmr.msra.gmra.mxu1 %vm73_vm0, %v135_v59 }
 0x124   :  { %1549 = vmatmul.msk.bf16.vlgmr.msra.gmra.mxu2 %vm73_vm0, %v135_v59 }
 0x133   :  { %1565 = vmatmul.msk.bf16.vlgmr.msrb.gmra.mxu1 %vm73_vm0, %v135_v59 }
 0x134   :  { %1579 = vmatmul.msk.bf16.vlgmr.msrb.gmra.mxu2 %vm73_vm0, %v135_v59 }
 0x1a0   :  { %v168_v60 = vpop.f32.mrf.mxu0  ;;  %v206_v61 = vpop.f32.mrf.mxu1 }
 0x1a1   :  { %v207_v3 = vadd.f32 %v1848_v62, %v206_v61  ;;  %v169_v9 = vadd.f32 %v1847_v2, %v168_v60 }
 0x1a3   :  { %v173_v17 = vmul.f32 0.25, %v169_v9 }
 0x1a7   :  { %v242_v63 = vpop.f32.mrf.mxu2 }
 0x1a8   :  { %v170_v0 = vpop.f32.mrf.mxu0  ;;  %v208_v1 = vpop.f32.mrf.mxu1  ;;  %v243_v15 = vadd.f32 %v1849_v8, %v242_v63 }
 0x1a9   :  { %v209_v4 = vadd.f32 %v1848_v62, %v208_v1  ;;  %v171_v5 = vadd.f32 %v1847_v2, %v170_v0 }
 0x1ab   :  { %v248_v6 = vpack.c.bf16 %v209_v4, %v207_v3  ;;  %v174_v12 = vmul.f32 0.25, %v171_v5 }
 0x1ad   :  { %v254_v11 = vsel %vm249_vm8, %v248_v6, 0  ;;  %v247_v19 = vpack.c.bf16 %v174_v12, %v173_v17  ;;  %v1805_v6 = vld [vmem:[%s2435_s6] sm:$0xff] }
 0x1ae   :  { %263 = vmatpush.bf16.xpose.msra.mxu3 %v254_v11 }
 0x1af   :  { %v244_v13 = vpop.f32.mrf.mxu2 }
 0x1b0   :  { %v245_v16 = vadd.f32 %v1849_v8, %v244_v13  ;;  %v345_v49 = vpop.f32.mrf.mxu1 }
 0x1b1   :  { %v346_v55 = vadd.f32 %v1850_v53, %v345_v49 }
 0x1b2   :  { %v291_v18 = vpack.c.bf16 %v245_v16, %v243_v15 }
 0x1b4   :  { %302 = vmatpush.bf16.msrb.mxu0 %v291_v18 }
 0x1b5   :  { %1550 = vmatmul.msk.bf16.vlgmr.msra.gmra.mxu3 %vm249_vm8, %v247_v19 }
 0x1b6   :  { %416 = vmatpush.bf16.msrb.mxu3 %v1811_v7 }
 0x1b7   :  { %v383_v20 = vpop.f32.mrf.mxu2 }
 0x1b8   :  { %v384_v23 = vadd.f32 %v1851_v21, %v383_v20  ;;  %v347_v52 = vpop.f32.mrf.mxu1 }
 0x1b9   :  { %v348_v54 = vadd.f32 %v1850_v53, %v347_v52 }
 0x1ba   :  { %417 = vmatpush.bf16.msrb.mxu3 %v1810_v14 }
 0x1bb   :  { %v351_v56 = vmul.f32 0.25, %v348_v54 }
 0x1be   :  { %530 = vmatpush.bf16.msra.mxu3 %v1805_v6 }
 0x1bf   :  { %v385_v22 = vpop.f32.mrf.mxu2 }
 0x1c0   :  { %v386_v24 = vadd.f32 %v1851_v21, %v385_v22 }
 0x1c2   :  { %v425_v25 = vpack.c.bf16 %v386_v24, %v384_v23 }
 0x1c4   :  { %v430_v26 = vsel %vm249_vm8, %v425_v25, 0 }
 0x1c5   :  { %439 = vmatpush.bf16.xpose.msra.mxu0 %v430_v26  ;;  %1593 = vmatmul.msk.bf16.vlgmr.msrb.gmra.mxu3 %vm73_vm0, %v135_v59  ;;  %v350_v59 = vmul.f32 0.25, %v346_v55  ;;  %v1812_v26 = vld [vmem:[%s2435_s6 + $0x8] sm:$0xff] }
 0x1c6   :  { %507 = vmatpush.bf16.msra.mxu2 %v1812_v26 }
 0x1c7   :  { %v424_v60 = vpack.c.bf16 %v351_v56, %v350_v59 }
 0x238   :  { %v265_v28 = vpop.f32.mrf.mxu3 }
 0x239   :  { %v266_v29 = vadd.f32 %v265_v28, %v2160_v27 }
 0x23b   :  { %v270_v30 = vsel %vm249_vm8, %v266_v29, -inf }
 0x23c   :  { %271 = vmax.xlane.f32.xlu2 %v270_v30 }
 0x240   :  { %v267_v32 = vpop.f32.mrf.mxu3 }
 0x241   :  { %v268_v33 = vadd.f32 %v267_v32, %v2167_v31 }
 0x243   :  { %v273_v34 = vsel %vm249_vm8, %v268_v33, -inf }
 0x244   :  { %274 = vmax.xlane.f32.xlu2 %v273_v34 }
 0x248   :  { %v419_v35 = vpop.f32.mrf.mxu3 }
 0x249   :  { %v420_v38 = vadd.f32 %v1852_v36, %v419_v35 }
 0x250   :  { %v421_v37 = vpop.f32.mrf.mxu3 }
 0x251   :  { %v422_v39 = vadd.f32 %v1852_v36, %v421_v37 }
 0x253   :  { %v467_v40 = vpack.c.bf16 %v422_v39, %v420_v38  ;;  %v1853_v39 = vld [vmem:[%s2436_s7] ss:$0 sm:$0xff] }
 0x255   :  { %478 = vmatpush.bf16.msra.mxu1 %v467_v40 }
 0x2af   :  { %v272_v41 = vpop.xlane.xlu2 %271 }
 0x2b0   :  { %v276_v42 = vsub.f32 %v266_v29, %v272_v41 }
 0x2b2   :  { %v278_v43 = vmul.f32 1.442695, %v276_v42 }
 0x2b4   :  { %1881 = vpow2.f32 %v278_v43 }
 0x2b7   :  { %v275_v44 = vpop.xlane.xlu2 %274 }
 0x2b8   :  { %v277_v45 = vsub.f32 %v268_v33, %v275_v44 }
 0x2ba   :  { %v1882_v46 = vpop.eup %1881  ;;  %v280_v47 = vmul.f32 1.442695, %v277_v45 }
 0x2bb   :  { %v282_v48 = vsel %vm249_vm8, %v1882_v46, 0.0 }
 0x2bc   :  { %1883 = vpow2.f32 %v280_v47  ;;  %283 = vadd.xlane.f32.xlu2 %v282_v48 }
 0x2c2   :  { %v1884_v50 = vpop.eup %1883 }
 0x2c3   :  { %v290_v51 = vpack.c.bf16 %v1884_v50, %v1882_v46  ;;  %v285_v5 = vsel %vm249_vm8, %v1884_v50, 0.0 }
 0x2c5   :  { %1551 = vmatmul.msk.bf16.vlgmr.msrb.gmra.mxu0 %vm249_vm8, %v290_v51 }
 0x2d5   :  { %1594 = vmatmul.msk.bf16.vlgmr.msra.gmra.mxu0 %vm249_vm8, %v424_v60 }
 0x32f   :  { %v284_v11 = vpop.xlane.xlu2 %283 }
 0x342   :  { %v304_v61 = vpop.f32.mrf.mxu0 }
 0x34a   :  { %v306_v62 = vpop.f32.mrf.mxu0 }
 0x352   :  { %v441_v63 = vpop.f32.mrf.mxu0 }
 0x353   :  { %v442_v0 = vadd.f32 %v441_v63, %v2160_v27 }
 0x355   :  { %v446_v1 = vsel %vm249_vm8, %v442_v0, -inf }
 0x356   :  { %447 = vmax.xlane.f32.xlu0 %v446_v1  ;;  %v1813_v1 = vld [vmem:[%s2439_s10] sm:$0xff] }
 0x35a   :  { %v443_v2 = vpop.f32.mrf.mxu0 }
 0x35b   :  { %v444_v3 = vadd.f32 %v443_v2, %v2167_v31 }
 0x35d   :  { %v449_v4 = vsel %vm249_vm8, %v444_v3, -inf }
 0x35e   :  { %450 = vmax.xlane.f32.xlu1 %v449_v4  ;;  %286 = vadd.xlane.f32.xlu0 %v285_v5 }
 0x3c9   :  { %v448_v7 = vpop.xlane.xlu0 %447 }
 0x3ca   :  { %v452_v8 = vsub.f32 %v442_v0, %v448_v7 }
 0x3cc   :  { %v454_v9 = vmul.f32 1.442695, %v452_v8 }
 0x3ce   :  { %1885 = vpow2.f32 %v454_v9 }
 0x3cf   :  { %1887 = vrcp.f32 %v284_v11 }
 0x3d1   :  { %v451_v12 = vpop.xlane.xlu1 %450  ;;  %v287_v13 = vpop.xlane.xlu0 %286 }
 0x3d2   :  { %v453_v14 = vsub.f32 %v444_v3, %v451_v12  ;;  %1889 = vrcp.f32 %v287_v13 }
 0x3d4   :  { %v1886_v15 = vpop.eup %1885  ;;  %v456_v16 = vmul.f32 1.442695, %v453_v14 }
 0x3d5   :  { %v458_v17 = vsel %vm249_vm8, %v1886_v15, 0.0  ;;  %v1888_v18 = vpop.eup %1887 }
 0x3d6   :  { %1891 = vpow2.f32 %v456_v16  ;;  %459 = vadd.xlane.f32.xlu1 %v458_v17  ;;  %v309_v20 = vmul.f32 %v1888_v18, %v304_v61  ;;  %v1854_v18 = vld [vmem:[%s2437_s8] ss:$0 sm:$0xff] }
 0x3d8   :  { %v1890_v19 = vpop.eup %1889 }
 0x3d9   :  { %v310_v21 = vmul.f32 %v1890_v19, %v306_v62 }
 0x3db   :  { %v311_v22 = vpack.c.bf16 %v310_v21, %v309_v20 }
 0x3dc   :  { %v1892_v23 = vpop.eup %1891 }
 0x3dd   :  { %v466_v24 = vpack.c.bf16 %v1892_v23, %v1886_v15  ;;  %1607 = vmatmul.msk.bf16.vlgmr.msra.gmra.mxu3 %vm249_vm8, %v311_v22  ;;  %v461_v25 = vsel %vm249_vm8, %v1892_v23, 0.0  ;;  %v1855_v22 = vld [vmem:[%s2438_s9] ss:$0 sm:$0xff] }
 0x3de   :  { %462 = vadd.xlane.f32.xlu2 %v461_v25 }
 0x3df   :  { %1595 = vmatmul.msk.bf16.vlgmr.msra.gmra.mxu1 %vm249_vm8, %v466_v24 }
 0x449   :  { %v460_v28 = vpop.xlane.xlu1 %459 }
 0x44a   :  { %1893 = vrcp.f32 %v460_v28 }
 0x450   :  { %v1894_v32 = vpop.eup %1893 }
 0x451   :  { %v463_v29 = vpop.xlane.xlu2 %462 }
 0x452   :  { %1895 = vrcp.f32 %v463_v29 }
 0x458   :  { %v1896_v33 = vpop.eup %1895 }
 0x45c   :  { %v480_v30 = vpop.f32.mrf.mxu1 }
 0x45d   :  { %v485_v35 = vmul.f32 %v1894_v32, %v480_v30  ;;  %v1818_v30 = vld [vmem:[%s2441_s12 + $0x18] sm:$0xff]  ;;  %v1817_v32 = vld [vmem:[%s2441_s12 + $0x10] sm:$0xff] }
 0x45e   :  { %702 = vmatpush.bf16.msrb.mxu1 %v1818_v30  ;;  %v1828_v30 = vld [vmem:[%s2459_s26 + $0x90] sm:$0xff] }
 0x460   :  { %v532_v38 = vpop.f32.mrf.mxu3 }
 0x462   :  { %703 = vmatpush.bf16.msrb.mxu1 %v1817_v32 }
 0x464   :  { %v482_v34 = vpop.f32.mrf.mxu1 }
 0x465   :  { %v486_v36 = vmul.f32 %v1896_v33, %v482_v34  ;;  %v1816_v33 = vld [vmem:[%s2441_s12 + $0x8] sm:$0xff]  ;;  %v1815_v34 = vld [vmem:[%s2441_s12] sm:$0xff] }
 0x466   :  { %704 = vmatpush.bf16.msrb.mxu1 %v1816_v33 }
 0x467   :  { %v487_v37 = vpack.c.bf16 %v486_v36, %v485_v35  ;;  %v1856_v35 = vld [vmem:[%s2440_s11] ss:$0 sm:$0xff] }
 0x468   :  { %v534_v45 = vpop.f32.mrf.mxu3 }
 0x469   :  { %1602 = vmatmul.msk.bf16.vlgmr.msra.gmra.mxu2 %vm249_vm8, %v487_v37 }
 0x46a   :  { %705 = vmatpush.bf16.msrb.mxu1 %v1815_v34 }
 0x4ec   :  { %v509_v40 = vpop.f32.mrf.mxu2 }
 0x4ed   :  { %v533_v41 = vadd.f32 %v532_v38, %v509_v40 }
 0x4ef   :  { %v541_v42 = vadd.f32 %v1853_v39, %v533_v41 }
 0x4f1   :  { %v543_v43 = vadd.f32 %v541_v42, %v2124_v57 }
 0x4f3   :  { %v547_v44 = vsel %vm73_vm0, %v543_v43, 0.0 }
 0x4f4   :  { %548 = vadd.xlane.f32.xlu0 %v547_v44  ;;  %v511_v46 = vpop.f32.mrf.mxu2 }
 0x4f5   :  { %v535_v47 = vadd.f32 %v534_v45, %v511_v46 }
 0x4f7   :  { %v542_v48 = vadd.f32 %v1853_v39, %v535_v47 }
 0x4f9   :  { %v544_v49 = vadd.f32 %v542_v48, %v2126_v58  ;;  %v1814_v58 = vld [vmem:[%s2439_s10 + $0x8] sm:$0xff] }
 0x4fa   :  { %631 = vmatpush.bf16.msrb.mxu0 %v1814_v58 }
 0x4fb   :  { %v550_v50 = vsel %vm73_vm0, %v544_v49, 0.0 }
 0x4fc   :  { %551 = vadd.xlane.f32.xlu1 %v550_v50 }
 0x4fe   :  { %632 = vmatpush.bf16.msrb.mxu0 %v1813_v1 }
 0x567   :  { %v549_v51 = vpop.xlane.xlu0 %548 }
 0x568   :  { %v553_v52 = vmul.f32 %v549_v51, %v2080_v10 }
 0x56a   :  { %v555_v53 = vsub.f32 %v543_v43, %v553_v52 }
 0x56c   :  { %v557_v54 = vmul.f32 %v555_v53, %v555_v53 }
 0x56e   :  { %v559_v55 = vsel %vm73_vm0, %v557_v54, 0.0 }
 0x56f   :  { %560 = vadd.xlane.f32.xlu2 %v559_v55  ;;  %v552_v57 = vpop.xlane.xlu1 %551 }
 0x570   :  { %v554_v56 = vmul.f32 %v552_v57, %v2080_v10 }
 0x572   :  { %v556_v59 = vsub.f32 %v544_v49, %v554_v56 }
 0x574   :  { %v558_v60 = vmul.f32 %v556_v59, %v556_v59 }
 0x576   :  { %v562_v61 = vsel %vm73_vm0, %v558_v60, 0.0  ;;  %v1857_v60 = vld [vmem:[%s2442_s13] ss:$0 sm:$0xff] }
 0x577   :  { %563 = vadd.xlane.f32.xlu0 %v562_v61 }
 0x5e2   :  { %v561_v62 = vpop.xlane.xlu2 %560 }
 0x5e3   :  { %v565_v63 = vmul.f32 %v561_v62, %v2080_v10 }
 0x5e5   :  { %v567_v0 = vadd.f32 1e-05, %v565_v63 }
 0x5e7   :  { %1897 = vrsqrt.f32 %v567_v0  ;;  %vm575_vm10 = vweird.f32 %v567_v0 }
 0x5ea   :  { %v564_v2 = vpop.xlane.xlu0 %563 }
 0x5eb   :  { %v566_v3 = vmul.f32 %v564_v2, %v2080_v10 }
 0x5ed   :  { %v1898_v4 = vpop.eup %1897  ;;  %v568_v5 = vadd.f32 1e-05, %v566_v3 }
 0x5ee   :  { %v570_v6 = vmul.f32 %v1898_v4, %v567_v0  ;;  %vm576_vm9 = vweird.f32 %v1898_v4 }
 0x5ef   :  { %1899 = vrsqrt.f32 %v568_v5  ;;  %vm577_vm11 = vmor %vm575_vm10, %vm576_vm9  ;;  %vm585_vm13 = vweird.f32 %v568_v5 }
 0x5f0   :  { %v571_v7 = vmul.f32 %v1898_v4, %v570_v6 }
 0x5f2   :  { %v572_v8 = vmul.f32 0.5, %v571_v7 }
 0x5f4   :  { %v573_v9 = vsub.f32 1.5, %v572_v8 }
 0x5f5   :  { %v1900_v11 = vpop.eup %1899 }
 0x5f6   :  { %v574_v12 = vmul.f32 %v1898_v4, %v573_v9  ;;  %v580_v13 = vmul.f32 %v1900_v11, %v568_v5  ;;  %vm586_vm12 = vweird.f32 %v1900_v11 }
 0x5f7   :  { %vm587_vm14 = vmor %vm585_vm13, %vm586_vm12 }
 0x5f8   :  { %v581_v14 = vmul.f32 %v1900_v11, %v580_v13  ;;  %v578_v15 = vsel %vm577_vm11, %v1898_v4, %v574_v12 }
 0x5f9   :  { %v589_v19 = vmul.f32 %v578_v15, %v555_v53  ;;  %v1820_v15 = vld [vmem:[%s2459_s26 + $0x68] sm:$0xff] }
 0x5fa   :  { %v582_v16 = vmul.f32 0.5, %v581_v14  ;;  %802 = vmatpush.bf16.msrb.mxu2 %v1820_v15  ;;  %v1863_v15 = vld [vmem:[%s2434_s5 + $0x9] ss:$0 sm:$0xff] }
 0x5fb   :  { %v594_v23 = vmul.f32 %v1854_v18, %v589_v19 }
 0x5fc   :  { %v583_v17 = vsub.f32 1.5, %v582_v16  ;;  %v1822_v16 = vld [vmem:[%s2459_s26 + $0x88] sm:$0xff] }
 0x5fd   :  { %v599_v26 = vadd.f32 %v1855_v22, %v594_v23  ;;  %840 = vmatpush.bf16.msrb.mxu3 %v1822_v16  ;;  %v1823_v23 = vld [vmem:[%s2459_s26 + $0xa0] sm:$0xff] }
 0x5fe   :  { %v584_v20 = vmul.f32 %v1900_v11, %v583_v17  ;;  %v1824_v17 = vld [vmem:[%s2459_s26 + $0xa8] sm:$0xff] }
 0x5ff   :  { %876 = vmatpush.bf16.msra.mxu0 %v1824_v17 }
 0x600   :  { %v588_v21 = vsel %vm587_vm14, %v1900_v11, %v584_v20 }
 0x601   :  { %v590_v24 = vmul.f32 %v588_v21, %v556_v59  ;;  %v1819_v21 = vld [vmem:[%s2459_s26 + $0x60] sm:$0xff] }
 0x602   :  { %803 = vmatpush.bf16.msrb.mxu2 %v1819_v21 }
 0x603   :  { %v595_v25 = vmul.f32 %v1854_v18, %v590_v24  ;;  %877 = vmatpush.bf16.msra.mxu0 %v1823_v23 }
 0x605   :  { %v600_v28 = vadd.f32 %v1855_v22, %v595_v25  ;;  %v1821_v22 = vld [vmem:[%s2459_s26 + $0x80] sm:$0xff]  ;;  %v1827_v25 = vld [vmem:[%s2459_s26 + $0x78] sm:$0xff] }
 0x606   :  { %841 = vmatpush.bf16.msrb.mxu3 %v1821_v22 }
 0x607   :  { %v601_v29 = vpack.c.bf16 %v600_v28, %v599_v26 }
 0x609   :  { %1616 = vmatmul.msk.bf16.vlgmr.msrb.gmra.mxu0 %vm73_vm0, %v601_v29  ;;  %v1826_v29 = vld [vmem:[%s2459_s26 + $0x70] sm:$0xff] }
 0x60a   :  { %979 = vmatpush.bf16.msra.mxu3 %v1827_v25 }
 0x60e   :  { %980 = vmatpush.bf16.msra.mxu3 %v1826_v29 }
 0x686   :  { %v634_v36 = vpop.f32.mrf.mxu0 }
 0x687   :  { %v635_v37 = vadd.f32 %v1856_v35, %v634_v36 }
 0x689   :  { %v641_v38 = vmul.f32 0.044715, %v635_v37  ;;  %v639_v53 = vmul.f32 0.5, %v635_v37 }
 0x68b   :  { %v643_v39 = vmul.f32 %v641_v38, %v635_v37 }
 0x68d   :  { %v645_v40 = vmul.f32 %v643_v39, %v635_v37 }
 0x68e   :  { %v636_v41 = vpop.f32.mrf.mxu0 }
 0x68f   :  { %v647_v42 = vadd.f32 %v645_v40, %v635_v37  ;;  %v637_v43 = vadd.f32 %v1856_v35, %v636_v41 }
 0x691   :  { %v642_v44 = vmul.f32 0.044715, %v637_v43  ;;  %v649_v45 = vmul.f32 0.7978846, %v647_v42  ;;  %v640_v54 = vmul.f32 0.5, %v637_v43 }
 0x693   :  { %v644_v46 = vmul.f32 %v642_v44, %v637_v43  ;;  %1901 = vtanh.f32 %v649_v45  ;;  %v1858_v45 = vld [vmem:[%s2443_s14] ss:$0 sm:$0xff] }
 0x695   :  { %v646_v47 = vmul.f32 %v644_v46, %v637_v43 }
 0x697   :  { %v648_v48 = vadd.f32 %v646_v47, %v637_v43 }
 0x699   :  { %v650_v49 = vmul.f32 0.7978846, %v648_v48  ;;  %v1902_v50 = vpop.eup %1901 }
 0x69a   :  { %v653_v51 = vadd.f32 1.0, %v1902_v50 }
 0x69b   :  { %1903 = vtanh.f32 %v650_v49  ;;  %v1859_v49 = vld [vmem:[%s2444_s15] ss:$0 sm:$0xff] }
 0x69c   :  { %v655_v57 = vmul.f32 %v653_v51, %v639_v53 }
 0x6a1   :  { %v1904_v52 = vpop.eup %1903 }
 0x6a2   :  { %v654_v55 = vadd.f32 1.0, %v1904_v52 }
 0x6a4   :  { %v656_v56 = vmul.f32 %v654_v55, %v640_v54 }
 0x6a6   :  { %v657_v59 = vpack.c.bf16 %v656_v56, %v655_v57  ;;  %v1860_v56 = vld [vmem:[%s2434_s5 + $0xa] ss:$0 sm:$0xff] }
 0x6a8   :  { %1633 = vmatmul.msk.bf16.vlgmr.msrb.gmra.mxu1 %vm694_vm15, %v657_v59 }
 0x725   :  { %v707_v61 = vpop.f32.mrf.mxu1 }
 0x726   :  { %v708_v58 = vadd.f32 %v1857_v60, %v707_v61 }
 0x728   :  { %v712_v62 = vadd.f32 %v708_v58, %v599_v26  ;;  %v1829_v26 = vld [vmem:[%s2459_s26 + $0x98] sm:$0xff] }
 0x729   :  { %1017 = vmatpush.bf16.msrb.mxu0 %v1829_v26 }
 0x72a   :  { %v716_v63 = vsel %vm73_vm0, %v712_v62, 0.0 }
 0x72b   :  { %717 = vadd.xlane.f32.xlu1 %v716_v63  ;;  %v1862_v63 = vld [vmem:[%s2434_s5 + $0x8] ss:$0 sm:$0xff] }
 0x72d   :  { %v709_v0 = vpop.f32.mrf.mxu1  ;;  %1018 = vmatpush.bf16.msrb.mxu0 %v1828_v30 }
 0x72e   :  { %v710_v1 = vadd.f32 %v1857_v60, %v709_v0 }
 0x730   :  { %v713_v2 = vadd.f32 %v710_v1, %v600_v28 }
 0x732   :  { %v719_v3 = vsel %vm73_vm0, %v713_v2, 0.0 }
 0x733   :  { %720 = vadd.xlane.f32.xlu2 %v719_v3  ;;  %v1861_v3 = vld [vmem:[%s2434_s5 + $0x6] ss:$0 sm:$0xff] }
 0x79e   :  { %v718_v4 = vpop.xlane.xlu1 %717 }
 0x79f   :  { %v722_v5 = vmul.f32 %v718_v4, %v2080_v10 }
 0x7a1   :  { %v724_v6 = vsub.f32 %v712_v62, %v722_v5 }
 0x7a3   :  { %v726_v7 = vmul.f32 %v724_v6, %v724_v6 }
 0x7a5   :  { %v728_v8 = vsel %vm73_vm0, %v726_v7, 0.0 }
 0x7a6   :  { %v721_v9 = vpop.xlane.xlu2 %720  ;;  %729 = vadd.xlane.f32.xlu0 %v728_v8 }
 0x7a7   :  { %v723_v11 = vmul.f32 %v721_v9, %v2080_v10  ;;  %v1831_v9 = vld [vmem:[%s2459_s26 + $0xb8] sm:$0xff] }
 0x7a9   :  { %v725_v12 = vsub.f32 %v713_v2, %v723_v11 }
 0x7ab   :  { %v727_v13 = vmul.f32 %v725_v12, %v725_v12 }
 0x7ad   :  { %v731_v14 = vsel %vm73_vm0, %v727_v13, 0.0 }
 0x7ae   :  { %732 = vadd.xlane.f32.xlu1 %v731_v14  ;;  %v1830_v14 = vld [vmem:[%s2459_s26 + $0xb0] sm:$0xff]  ;;  %s1966_s26 = smov [#allocation2]  }
 0x819   :  { %v730_v18 = vpop.xlane.xlu0 %729 }
 0x81a   :  { %v734_v19 = vmul.f32 %v730_v18, %v2080_v10 }
 0x81c   :  { %v736_v20 = vadd.f32 1e-05, %v734_v19 }
 0x81e   :  { %1905 = vrsqrt.f32 %v736_v20  ;;  %vm744_vm2 = vweird.f32 %v736_v20 }
 0x821   :  { %v733_v24 = vpop.xlane.xlu1 %732 }
 0x822   :  { %v735_v28 = vmul.f32 %v733_v24, %v2080_v10 }
 0x824   :  { %v1906_v32 = vpop.eup %1905  ;;  %v737_v33 = vadd.f32 1e-05, %v735_v28 }
 0x825   :  { %v739_v34 = vmul.f32 %v1906_v32, %v736_v20  ;;  %vm745_vm1 = vweird.f32 %v1906_v32 }
 0x826   :  { %1907 = vrsqrt.f32 %v737_v33  ;;  %vm746_vm3 = vmor %vm744_vm2, %vm745_vm1  ;;  %vm754_vm5 = vweird.f32 %v737_v33 }
 0x827   :  { %v740_v35 = vmul.f32 %v1906_v32, %v739_v34 }
 0x829   :  { %v741_v36 = vmul.f32 0.5, %v740_v35 }
 0x82b   :  { %v742_v37 = vsub.f32 1.5, %v741_v36 }
 0x82c   :  { %v1908_v38 = vpop.eup %1907 }
 0x82d   :  { %v743_v39 = vmul.f32 %v1906_v32, %v742_v37  ;;  %v749_v40 = vmul.f32 %v1908_v38, %v737_v33  ;;  %vm755_vm4 = vweird.f32 %v1908_v38 }
 0x82e   :  { %vm756_vm6 = vmor %vm754_vm5, %vm755_vm4  ;;  %vm1418_vm4 = vcmask 1040384   ;;  %vm1495_vm5 = vcmask 9216  }
 0x82f   :  { %v750_v41 = vmul.f32 %v1908_v38, %v749_v40  ;;  %v747_v42 = vsel %vm746_vm3, %v1906_v32, %v743_v39  ;;  %v1865_v32 = vld [vmem:[%s2434_s5 + $0xb] ss:$0 sm:$0xff] }
 0x830   :  { %v758_v46 = vmul.f32 %v747_v42, %v724_v6 }
 0x831   :  { %v751_v43 = vmul.f32 0.5, %v750_v41 }
 0x832   :  { %v763_v50 = vmul.f32 %v1858_v45, %v758_v46 }
 0x833   :  { %v752_v44 = vsub.f32 1.5, %v751_v43 }
 0x834   :  { %v2285_v53 = vadd.f32 %v1859_v49, %v763_v50 }
 0x835   :  { %v753_v47 = vmul.f32 %v1908_v38, %v752_v44 }
 0x837   :  { %v757_v48 = vsel %vm756_vm6, %v1908_v38, %v753_v47 }
 0x838   :  { %v759_v51 = vmul.f32 %v757_v48, %v725_v12 }
 0x83a   :  { %v764_v52 = vmul.f32 %v1858_v45, %v759_v51 }
 0x83c   :  { %v2287_v54 = vadd.f32 %v1859_v49, %v764_v52  ;;  %v1864_v49 = vld [vmem:[%s2434_s5 + $0x7] ss:$0 sm:$0xff] }
 0x83e   :  { %v770_v55 = vpack.c.bf16 %v2287_v54, %v2285_v53 }
 0x840   :  { %1647 = vmatmul.msk.bf16.vlgmr.msrb.gmra.mxu2 %vm73_vm0, %v770_v55  ;;  %1661 = vmatmul.msk.bf16.vlgmr.msrb.gmra.mxu3 %vm73_vm0, %v770_v55 }
 0x841   :  { %1675 = vmatmul.msk.bf16.vlgmr.msra.gmra.mxu0 %vm73_vm0, %v770_v55 }
 0x850   :  { %1693 = vmatmul.msk.bf16.vlgmr.msra.gmra.mxu3 %vm73_vm0, %v770_v55 }
 0x851   :  { %1707 = vmatmul.msk.bf16.vlgmr.msrb.gmra.mxu0 %vm73_vm0, %v770_v55 }
 0x8be   :  { %v879_v57 = vpop.f32.mrf.mxu0 }
 0x8bf   :  { %v880_v58 = vadd.f32 %v1860_v56, %v879_v57 }
 0x8c3   :  { %v805_v59 = vpop.f32.mrf.mxu2  ;;  %v843_v60 = vpop.f32.mrf.mxu3 }
 0x8c4   :  { %v844_v4 = vadd.f32 %v1862_v63, %v843_v60  ;;  %v806_v11 = vadd.f32 %v1861_v3, %v805_v59 }
 0x8c6   :  { %v881_v61 = vpop.f32.mrf.mxu0  ;;  %v810_v16 = vmul.f32 0.25, %v806_v11 }
 0x8c7   :  { %v882_v62 = vadd.f32 %v1860_v56, %v881_v61 }
 0x8c9   :  { %v927_v0 = vpack.c.bf16 %v882_v62, %v880_v58 }
 0x8cb   :  { %938 = vmatpush.bf16.msra.mxu2 %v927_v0  ;;  %v807_v1 = vpop.f32.mrf.mxu2  ;;  %v845_v2 = vpop.f32.mrf.mxu3 }
 0x8cc   :  { %v846_v5 = vadd.f32 %v1862_v63, %v845_v2  ;;  %v808_v6 = vadd.f32 %v1861_v3, %v807_v1  ;;  %v1825_v2 = vld [vmem:[%s2435_s6 + $0x10] sm:$0xff] }
 0x8ce   :  { %v885_v7 = vpack.c.bf16 %v846_v5, %v844_v4  ;;  %v1020_v8 = vpop.f32.mrf.mxu0  ;;  %v811_v13 = vmul.f32 0.25, %v808_v6 }
 0x8cf   :  { %v1021_v19 = vadd.f32 %v1863_v15, %v1020_v8 }
 0x8d0   :  { %v890_v12 = vsel %vm249_vm8, %v885_v7, 0  ;;  %v884_v17 = vpack.c.bf16 %v811_v13, %v810_v16 }
 0x8d1   :  { %899 = vmatpush.bf16.xpose.msra.mxu1 %v890_v12 }
 0x8d3   :  { %v982_v45 = vpop.f32.mrf.mxu3 }
 0x8d4   :  { %v983_v51 = vadd.f32 %v1864_v49, %v982_v45 }
 0x8d6   :  { %v1022_v18 = vpop.f32.mrf.mxu0 }
 0x8d7   :  { %v1023_v20 = vadd.f32 %v1863_v15, %v1022_v18 }
 0x8d8   :  { %1676 = vmatmul.msk.bf16.vlgmr.msra.gmra.mxu1 %vm249_vm8, %v884_v17 }
 0x8d9   :  { %1053 = vmatpush.bf16.msrb.mxu1 %v1831_v9  ;;  %v1062_v21 = vpack.c.bf16 %v1023_v20, %v1021_v19  ;;  %v1832_v20 = vld [vmem:[%s2435_s6 + $0x18] sm:$0xff] }
 0x8da   :  { %1144 = vmatpush.bf16.msra.mxu0 %v1832_v20 }
 0x8db   :  { %v1067_v22 = vsel %vm249_vm8, %v1062_v21, 0  ;;  %v984_v48 = vpop.f32.mrf.mxu3 }
 0x8dc   :  { %1076 = vmatpush.bf16.xpose.msrb.mxu2 %v1067_v22  ;;  %v985_v50 = vadd.f32 %v1864_v49, %v984_v48 }
 0x8dd   :  { %1054 = vmatpush.bf16.msrb.mxu1 %v1830_v14 }
 0x8de   :  { %v988_v52 = vmul.f32 0.25, %v985_v50 }
 0x8e1   :  { %1167 = vmatpush.bf16.msra.mxu1 %v1825_v2 }
 0x8e8   :  { %1721 = vmatmul.msk.bf16.vlgmr.msrb.gmra.mxu1 %vm73_vm0, %v770_v55  ;;  %v987_v55 = vmul.f32 0.25, %v983_v51 }
 0x8ea   :  { %v1061_v57 = vpack.c.bf16 %v988_v52, %v987_v55 }
 0x955   :  { %v901_v23 = vpop.f32.mrf.mxu1 }
 0x956   :  { %v902_v24 = vadd.f32 %v901_v23, %v2160_v27 }
 0x958   :  { %v906_v25 = vsel %vm249_vm8, %v902_v24, -inf }
 0x959   :  { %907 = vmax.xlane.f32.xlu2 %v906_v25 }
 0x95d   :  { %v903_v26 = vpop.f32.mrf.mxu1 }
 0x95e   :  { %v904_v28 = vadd.f32 %v903_v26, %v2167_v31 }
 0x960   :  { %v909_v29 = vsel %vm249_vm8, %v904_v28, -inf }
 0x961   :  { %910 = vmax.xlane.f32.xlu0 %v909_v29 }
 0x965   :  { %v1056_v30 = vpop.f32.mrf.mxu1 }
 0x966   :  { %v1057_v34 = vadd.f32 %v1865_v32, %v1056_v30 }
 0x96d   :  { %v1058_v33 = vpop.f32.mrf.mxu1 }
 0x96e   :  { %v1059_v35 = vadd.f32 %v1865_v32, %v1058_v33  ;;  %v1866_v33 = vld [vmem:[%s2436_s7 + $0x1] ss:$0 sm:$0xff] }
 0x970   :  { %v1104_v36 = vpack.c.bf16 %v1059_v35, %v1057_v34 }
 0x972   :  { %1115 = vmatpush.bf16.msrb.mxu3 %v1104_v36 }
 0x9cc   :  { %v908_v37 = vpop.xlane.xlu2 %907 }
 0x9cd   :  { %v912_v38 = vsub.f32 %v902_v24, %v908_v37 }
 0x9cf   :  { %v914_v39 = vmul.f32 1.442695, %v912_v38 }
 0x9d1   :  { %1909 = vpow2.f32 %v914_v39 }
 0x9d4   :  { %v911_v40 = vpop.xlane.xlu0 %910 }
 0x9d5   :  { %v913_v41 = vsub.f32 %v904_v28, %v911_v40 }
 0x9d7   :  { %v1910_v42 = vpop.eup %1909  ;;  %v916_v43 = vmul.f32 1.442695, %v913_v41 }
 0x9d8   :  { %v918_v44 = vsel %vm249_vm8, %v1910_v42, 0.0 }
 0x9d9   :  { %1911 = vpow2.f32 %v916_v43  ;;  %919 = vadd.xlane.f32.xlu0 %v918_v44 }
 0x9df   :  { %v1912_v46 = vpop.eup %1911 }
 0x9e0   :  { %v926_v47 = vpack.c.bf16 %v1912_v46, %v1910_v42  ;;  %v921_v1 = vsel %vm249_vm8, %v1912_v46, 0.0 }
 0x9e2   :  { %1677 = vmatmul.msk.bf16.vlgmr.msra.gmra.mxu2 %vm249_vm8, %v926_v47 }
 0x9f2   :  { %1722 = vmatmul.msk.bf16.vlgmr.msrb.gmra.mxu2 %vm249_vm8, %v1061_v57 }
 0xa4c   :  { %v920_v5 = vpop.xlane.xlu0 %919 }
 0xa65   :  { %v940_v56 = vpop.f32.mrf.mxu2 }
 0xa6d   :  { %v942_v59 = vpop.f32.mrf.mxu2 }
 0xa75   :  { %v1078_v60 = vpop.f32.mrf.mxu2 }
 0xa76   :  { %v1079_v61 = vadd.f32 %v1078_v60, %v2160_v27  ;;  %v1833_v60 = vld [vmem:[%s2439_s10 + $0x10] sm:$0xff] }
 0xa78   :  { %v1083_v58 = vsel %vm249_vm8, %v1079_v61, -inf }
 0xa79   :  { %1084 = vmax.xlane.f32.xlu1 %v1083_v58 }
 0xa7d   :  { %v1080_v62 = vpop.f32.mrf.mxu2 }
 0xa7e   :  { %v1081_v63 = vadd.f32 %v1080_v62, %v2167_v31 }
 0xa80   :  { %v1086_v0 = vsel %vm249_vm8, %v1081_v63, -inf }
 0xa81   :  { %1087 = vmax.xlane.f32.xlu2 %v1086_v0  ;;  %922 = vadd.xlane.f32.xlu1 %v921_v1 }
 0xaec   :  { %v1085_v3 = vpop.xlane.xlu1 %1084 }
 0xaed   :  { %v1089_v4 = vsub.f32 %v1079_v61, %v1085_v3 }
 0xaef   :  { %v1091_v27 = vmul.f32 1.442695, %v1089_v4 }
 0xaf1   :  { %1913 = vpow2.f32 %v1091_v27 }
 0xaf2   :  { %1915 = vrcp.f32 %v920_v5 }
 0xaf4   :  { %v1088_v6 = vpop.xlane.xlu2 %1087  ;;  %v923_v7 = vpop.xlane.xlu1 %922 }
 0xaf5   :  { %v1090_v31 = vsub.f32 %v1081_v63, %v1088_v6  ;;  %1917 = vrcp.f32 %v923_v7 }
 0xaf7   :  { %v1914_v8 = vpop.eup %1913  ;;  %v1093_v9 = vmul.f32 1.442695, %v1090_v31 }
 0xaf8   :  { %v1095_v11 = vsel %vm249_vm8, %v1914_v8, 0.0  ;;  %v1916_v12 = vpop.eup %1915 }
 0xaf9   :  { %1919 = vpow2.f32 %v1093_v9  ;;  %1096 = vadd.xlane.f32.xlu2 %v1095_v11  ;;  %v945_v14 = vmul.f32 %v1916_v12, %v940_v56  ;;  %v1867_v9 = vld [vmem:[%s2437_s8 + $0x1] ss:$0 sm:$0xff]  ;;  %s1502_s8 = sshll.u32 %s1966_s26, 4  ;;  %s1503_s8 = int_to_ptr.vmem [resolvable:$true] %s1502_s8 }
 0xafb   :  { %v1918_v13 = vpop.eup %1917 }
 0xafc   :  { %v946_v15 = vmul.f32 %v1918_v13, %v942_v59 }
 0xafe   :  { %v947_v16 = vpack.c.bf16 %v946_v15, %v945_v14  ;;  %v1868_v14 = vld [vmem:[%s2438_s9 + $0x1] ss:$0 sm:$0xff] }
 0xaff   :  { %v1920_v17 = vpop.eup %1919 }
 0xb00   :  { %v1103_v18 = vpack.c.bf16 %v1920_v17, %v1914_v8  ;;  %1735 = vmatmul.msk.bf16.vlgmr.msra.gmra.mxu1 %vm249_vm8, %v947_v16  ;;  %v1098_v19 = vsel %vm249_vm8, %v1920_v17, 0.0 }
 0xb01   :  { %1099 = vadd.xlane.f32.xlu0 %v1098_v19 }
 0xb02   :  { %1723 = vmatmul.msk.bf16.vlgmr.msrb.gmra.mxu3 %vm249_vm8, %v1103_v18 }
 0xb6c   :  { %v1097_v21 = vpop.xlane.xlu2 %1096 }
 0xb6d   :  { %1921 = vrcp.f32 %v1097_v21  ;;  %v1838_v21 = vld [vmem:[%s2441_s12 + $0x38] sm:$0xff] }
 0xb6e   :  { %1345 = vmatpush.bf16.msra.mxu3 %v1838_v21 }
 0xb73   :  { %v1922_v24 = vpop.eup %1921 }
 0xb74   :  { %v1100_v22 = vpop.xlane.xlu0 %1099 }
 0xb75   :  { %1923 = vrcp.f32 %v1100_v22  ;;  %v1837_v22 = vld [vmem:[%s2441_s12 + $0x30] sm:$0xff] }
 0xb76   :  { %1346 = vmatpush.bf16.msra.mxu3 %v1837_v22 }
 0xb7b   :  { %v1924_v25 = vpop.eup %1923 }
 0xb7d   :  { %v1169_v32 = vpop.f32.mrf.mxu1 }
 0xb85   :  { %v1117_v23 = vpop.f32.mrf.mxu3  ;;  %v1171_v39 = vpop.f32.mrf.mxu1 }
 0xb86   :  { %v1122_v28 = vmul.f32 %v1922_v24, %v1117_v23  ;;  %v1836_v23 = vld [vmem:[%s2441_s12 + $0x28] sm:$0xff]  ;;  %v1835_v24 = vld [vmem:[%s2441_s12 + $0x20] sm:$0xff] }
 0xb87   :  { %1347 = vmatpush.bf16.msra.mxu3 %v1836_v23 }
 0xb8b   :  { %1348 = vmatpush.bf16.msra.mxu3 %v1835_v24 }
 0xb8d   :  { %v1119_v26 = vpop.f32.mrf.mxu3 }
 0xb8e   :  { %v1123_v29 = vmul.f32 %v1924_v25, %v1119_v26  ;;  %v1869_v25 = vld [vmem:[%s2440_s11 + $0x1] ss:$0 sm:$0xff] }
 0xb90   :  { %v1124_v30 = vpack.c.bf16 %v1123_v29, %v1122_v28 }
 0xb92   :  { %1730 = vmatmul.msk.bf16.vlgmr.msra.gmra.mxu0 %vm249_vm8, %v1124_v30 }
 0xc0f   :  { %v1146_v34 = vpop.f32.mrf.mxu0 }
 0xc10   :  { %v1170_v35 = vadd.f32 %v1169_v32, %v1146_v34 }
 0xc12   :  { %v1179_v36 = vadd.f32 %v1866_v33, %v1170_v35 }
 0xc14   :  { %v1181_v37 = vadd.f32 %v1179_v36, %v2285_v53 }
 0xc16   :  { %v1187_v38 = vsel %vm73_vm0, %v1181_v37, 0.0 }
 0xc17   :  { %1188 = vadd.xlane.f32.xlu1 %v1187_v38  ;;  %v1148_v40 = vpop.f32.mrf.mxu0 }
 0xc18   :  { %v1172_v41 = vadd.f32 %v1171_v39, %v1148_v40 }
 0xc1a   :  { %v1180_v42 = vadd.f32 %v1866_v33, %v1172_v41 }
 0xc1c   :  { %v1182_v43 = vadd.f32 %v1180_v42, %v2287_v54  ;;  %v1834_v54 = vld [vmem:[%s2439_s10 + $0x18] sm:$0xff] }
 0xc1d   :  { %1273 = vmatpush.bf16.msra.mxu2 %v1834_v54 }
 0xc1e   :  { %v1190_v44 = vsel %vm73_vm0, %v1182_v43, 0.0 }
 0xc1f   :  { %1191 = vadd.xlane.f32.xlu2 %v1190_v44 }
 0xc21   :  { %1274 = vmatpush.bf16.msra.mxu2 %v1833_v60 }
 0xc8a   :  { %v1189_v45 = vpop.xlane.xlu1 %1188 }
 0xc8b   :  { %v1193_v46 = vmul.f32 %v1189_v45, %v2080_v10 }
 0xc8d   :  { %v1195_v47 = vsub.f32 %v1181_v37, %v1193_v46 }
 0xc8f   :  { %v1197_v48 = vmul.f32 %v1195_v47, %v1195_v47 }
 0xc91   :  { %v1199_v49 = vsel %vm73_vm0, %v1197_v48, 0.0 }
 0xc92   :  { %1200 = vadd.xlane.f32.xlu0 %v1199_v49  ;;  %v1192_v53 = vpop.xlane.xlu2 %1191 }
 0xc93   :  { %v1194_v50 = vmul.f32 %v1192_v53, %v2080_v10 }
 0xc95   :  { %v1196_v51 = vsub.f32 %v1182_v43, %v1194_v50  ;;  %v1870_v50 = vld [vmem:[%s2442_s13 + $0x1] ss:$0 sm:$0xff] }
 0xc97   :  { %v1198_v52 = vmul.f32 %v1196_v51, %v1196_v51 }
 0xc99   :  { %v1202_v55 = vsel %vm73_vm0, %v1198_v52, 0.0 }
 0xc9a   :  { %1203 = vadd.xlane.f32.xlu1 %v1202_v55 }
 0xd05   :  { %v1201_v57 = vpop.xlane.xlu0 %1200 }
 0xd06   :  { %v1205_v56 = vmul.f32 %v1201_v57, %v2080_v10 }
 0xd08   :  { %v1207_v59 = vadd.f32 1e-05, %v1205_v56 }
 0xd0a   :  { %1925 = vrsqrt.f32 %v1207_v59  ;;  %vm1215_vm8 = vweird.f32 %v1207_v59 }
 0xd0d   :  { %v1204_v61 = vpop.xlane.xlu1 %1203 }
 0xd0e   :  { %v1206_v58 = vmul.f32 %v1204_v61, %v2080_v10 }
 0xd10   :  { %v1926_v62 = vpop.eup %1925  ;;  %v1208_v63 = vadd.f32 1e-05, %v1206_v58 }
 0xd11   :  { %v1210_v0 = vmul.f32 %v1926_v62, %v1207_v59  ;;  %vm1216_vm7 = vweird.f32 %v1926_v62 }
 0xd12   :  { %1927 = vrsqrt.f32 %v1208_v63  ;;  %vm1217_vm9 = vmor %vm1215_vm8, %vm1216_vm7  ;;  %vm1225_vm11 = vweird.f32 %v1208_v63 }
 0xd13   :  { %v1211_v1 = vmul.f32 %v1926_v62, %v1210_v0 }
 0xd15   :  { %v1212_v2 = vmul.f32 0.5, %v1211_v1 }
 0xd17   :  { %v1213_v3 = vsub.f32 1.5, %v1212_v2 }
 0xd18   :  { %v1928_v4 = vpop.eup %1927 }
 0xd19   :  { %v1214_v27 = vmul.f32 %v1926_v62, %v1213_v3  ;;  %v1220_v5 = vmul.f32 %v1928_v4, %v1208_v63  ;;  %vm1226_vm10 = vweird.f32 %v1928_v4 }
 0xd1a   :  { %vm1227_vm12 = vmor %vm1225_vm11, %vm1226_vm10 }
 0xd1b   :  { %v1221_v6 = vmul.f32 %v1928_v4, %v1220_v5  ;;  %v1218_v7 = vsel %vm1217_vm9, %v1926_v62, %v1214_v27 }
 0xd1c   :  { %v1229_v11 = vmul.f32 %v1218_v7, %v1195_v47  ;;  %v1840_v7 = vld [vmem:[%s2445_s16 + $0x8] sm:$0xff] }
 0xd1d   :  { %v1222_v31 = vmul.f32 0.5, %v1221_v6  ;;  %1450 = vmatpush.bf16.msrb.mxu0 %v1840_v7 }
 0xd1e   :  { %v1234_v15 = vmul.f32 %v1867_v9, %v1229_v11 }
 0xd1f   :  { %v1223_v8 = vsub.f32 1.5, %v1222_v31 }
 0xd20   :  { %v1239_v18 = vadd.f32 %v1868_v14, %v1234_v15 }
 0xd21   :  { %v1224_v12 = vmul.f32 %v1928_v4, %v1223_v8  ;;  %v1839_v8 = vld [vmem:[%s2445_s16] sm:$0xff] }
 0xd22   :  { %1451 = vmatpush.bf16.msrb.mxu0 %v1839_v8 }
 0xd23   :  { %v1228_v13 = vsel %vm1227_vm12, %v1928_v4, %v1224_v12 }
 0xd24   :  { %v1230_v16 = vmul.f32 %v1228_v13, %v1196_v51 }
 0xd26   :  { %v1235_v17 = vmul.f32 %v1867_v9, %v1230_v16 }
 0xd28   :  { %v1240_v19 = vadd.f32 %v1868_v14, %v1235_v17 }
 0xd2a   :  { %v1241_v20 = vpack.c.bf16 %v1240_v19, %v1239_v18 }
 0xd2c   :  { %1752 = vmatmul.msk.bf16.vlgmr.msra.gmra.mxu2 %vm73_vm0, %v1241_v20 }
 0xdaf   :  { %v1276_v26 = vpop.f32.mrf.mxu2 }
 0xdb0   :  { %v1277_v28 = vadd.f32 %v1869_v25, %v1276_v26 }
 0xdb2   :  { %v1283_v29 = vmul.f32 0.044715, %v1277_v28  ;;  %v1281_v45 = vmul.f32 0.5, %v1277_v28 }
 0xdb4   :  { %v1285_v30 = vmul.f32 %v1283_v29, %v1277_v28 }
 0xdb6   :  { %v1287_v32 = vmul.f32 %v1285_v30, %v1277_v28  ;;  %v1872_v30 = vld [vmem:[%s2444_s15 + $0x1] ss:$0 sm:$0xff] }
 0xdb7   :  { %v1278_v33 = vpop.f32.mrf.mxu2 }
 0xdb8   :  { %v1289_v34 = vadd.f32 %v1287_v32, %v1277_v28  ;;  %v1279_v35 = vadd.f32 %v1869_v25, %v1278_v33 }
 0xdba   :  { %v1284_v36 = vmul.f32 0.044715, %v1279_v35  ;;  %v1291_v37 = vmul.f32 0.7978846, %v1289_v34  ;;  %v1282_v46 = vmul.f32 0.5, %v1279_v35 }
 0xdbc   :  { %v1286_v38 = vmul.f32 %v1284_v36, %v1279_v35  ;;  %1929 = vtanh.f32 %v1291_v37 }
 0xdbe   :  { %v1288_v39 = vmul.f32 %v1286_v38, %v1279_v35 }
 0xdc0   :  { %v1290_v40 = vadd.f32 %v1288_v39, %v1279_v35  ;;  %v1842_v39 = vld [vmem:[%s2447_s18 + $0x8] sm:$0xff] }
 0xdc1   :  { %1488 = vmatpush.bf16.msrb.mxu1 %v1842_v39 }
 0xdc2   :  { %v1292_v41 = vmul.f32 0.7978846, %v1290_v40  ;;  %v1930_v42 = vpop.eup %1929  ;;  %v1841_v40 = vld [vmem:[%s2447_s18] sm:$0xff] }
 0xdc3   :  { %v1295_v43 = vadd.f32 1.0, %v1930_v42 }
 0xdc4   :  { %1931 = vtanh.f32 %v1292_v41  ;;  %v1873_v41 = vld [vmem:[%s2446_s17] ss:$0 sm:$0xff] }
 0xdc5   :  { %v1297_v48 = vmul.f32 %v1295_v43, %v1281_v45  ;;  %1489 = vmatpush.bf16.msrb.mxu1 %v1841_v40 }
 0xdca   :  { %v1932_v44 = vpop.eup %1931 }
 0xdcb   :  { %v1296_v47 = vadd.f32 1.0, %v1932_v44 }
 0xdcd   :  { %v1298_v49 = vmul.f32 %v1296_v47, %v1282_v46  ;;  %v1874_v47 = vld [vmem:[%s2448_s19] ss:$0 sm:$0xff] }
 0xdcf   :  { %v1299_v53 = vpack.c.bf16 %v1298_v49, %v1297_v48 }
 0xdd1   :  { %1778 = vmatmul.msk.bf16.vlgmr.msra.gmra.mxu3 %vm694_vm15, %v1299_v53 }
 0xe54   :  { %v1350_v51 = vpop.f32.mrf.mxu3 }
 0xe55   :  { %v1351_v52 = vadd.f32 %v1870_v50, %v1350_v51 }
 0xe57   :  { %v1355_v55 = vadd.f32 %v1351_v52, %v1239_v18 }
 0xe59   :  { %v1361_v54 = vsel %vm73_vm0, %v1355_v55, 0.0 }
 0xe5a   :  { %1362 = vadd.xlane.f32.xlu0 %v1361_v54 }
 0xe5c   :  { %v1352_v57 = vpop.f32.mrf.mxu3 }
 0xe5d   :  { %v1353_v56 = vadd.f32 %v1870_v50, %v1352_v57 }
 0xe5f   :  { %v1356_v59 = vadd.f32 %v1353_v56, %v1240_v19 }
 0xe61   :  { %v1364_v60 = vsel %vm73_vm0, %v1356_v59, 0.0 }
 0xe62   :  { %1365 = vadd.xlane.f32.xlu2 %v1364_v60 }
 0xecd   :  { %v1363_v61 = vpop.xlane.xlu0 %1362 }
 0xece   :  { %v1367_v58 = vmul.f32 %v1363_v61, %v2080_v10 }
 0xed0   :  { %v1369_v62 = vsub.f32 %v1355_v55, %v1367_v58 }
 0xed2   :  { %v1371_v63 = vmul.f32 %v1369_v62, %v1369_v62 }
 0xed4   :  { %v1373_v0 = vsel %vm73_vm0, %v1371_v63, 0.0 }
 0xed5   :  { %v1366_v1 = vpop.xlane.xlu2 %1365  ;;  %1374 = vadd.xlane.f32.xlu2 %v1373_v0 }
 0xed6   :  { %v1368_v2 = vmul.f32 %v1366_v1, %v2080_v10 }
 0xed8   :  { %v1370_v3 = vsub.f32 %v1356_v59, %v1368_v2 }
 0xeda   :  { %v1372_v4 = vmul.f32 %v1370_v3, %v1370_v3 }
 0xedc   :  { %v1376_v27 = vsel %vm73_vm0, %v1372_v4, 0.0 }
 0xedd   :  { %1377 = vadd.xlane.f32.xlu1 %v1376_v27 }
 0xf48   :  { %v1375_v5 = vpop.xlane.xlu2 %1374 }
 0xf49   :  { %v1379_v6 = vmul.f32 %v1375_v5, %v2080_v10 }
 0xf4b   :  { %v1381_v31 = vadd.f32 1e-05, %v1379_v6 }
 0xf4d   :  { %1933 = vrsqrt.f32 %v1381_v31  ;;  %vm1389_vm14 = vweird.f32 %v1381_v31 }
 0xf50   :  { %v1378_v9 = vpop.xlane.xlu1 %1377 }
 0xf51   :  { %v1380_v11 = vmul.f32 %v1378_v9, %v2080_v10  ;;  %v1871_v10 = vld [vmem:[%s2443_s14 + $0x1] ss:$0 sm:$0xff] }
 0xf53   :  { %v1934_v12 = vpop.eup %1933  ;;  %v1382_v13 = vadd.f32 1e-05, %v1380_v11 }
 0xf54   :  { %v1384_v14 = vmul.f32 %v1934_v12, %v1381_v31  ;;  %vm1390_vm13 = vweird.f32 %v1934_v12 }
 0xf55   :  { %1935 = vrsqrt.f32 %v1382_v13  ;;  %vm1391_vm15 = vmor %vm1389_vm14, %vm1390_vm13  ;;  %vm1399_vm2 = vweird.f32 %v1382_v13 }
 0xf56   :  { %v1385_v15 = vmul.f32 %v1934_v12, %v1384_v14 }
 0xf58   :  { %v1386_v16 = vmul.f32 0.5, %v1385_v15 }
 0xf5a   :  { %v1387_v17 = vsub.f32 1.5, %v1386_v16 }
 0xf5b   :  { %v1936_v18 = vpop.eup %1935 }
 0xf5c   :  { %v1394_v19 = vmul.f32 %v1936_v18, %v1382_v13  ;;  %v1388_v20 = vmul.f32 %v1934_v12, %v1387_v17  ;;  %vm1400_vm1 = vweird.f32 %v1936_v18 }
 0xf5d   :  { %vm1401_vm3 = vmor %vm1399_vm2, %vm1400_vm1 }
 0xf5e   :  { %v1395_v21 = vmul.f32 %v1936_v18, %v1394_v19  ;;  %v1392_v23 = vsel %vm1391_vm15, %v1934_v12, %v1388_v20 }
 0xf5f   :  { %v1403_v26 = vmul.f32 %v1392_v23, %v1369_v62 }
 0xf60   :  { %v1396_v22 = vmul.f32 0.5, %v1395_v21 }
 0xf61   :  { %v1408_v32 = vmul.f32 %v1871_v10, %v1403_v26 }
 0xf62   :  { %v1397_v24 = vsub.f32 1.5, %v1396_v22 }
 0xf63   :  { %v1413_v35 = vadd.f32 %v1872_v30, %v1408_v32 }
 0xf64   :  { %v1398_v25 = vmul.f32 %v1936_v18, %v1397_v24 }
 0xf66   :  { %v1402_v28 = vsel %vm1401_vm3, %v1936_v18, %v1398_v25 }
 0xf67   :  { %v1404_v29 = vmul.f32 %v1402_v28, %v1370_v3 }
 0xf69   :  { %v1409_v33 = vmul.f32 %v1871_v10, %v1404_v29 }
 0xf6b   :  { %v1414_v34 = vadd.f32 %v1872_v30, %v1409_v33 }
 0xf6d   :  { %v1416_v36 = vrot.slane %v1414_v34, 7 }
 0xf6f   :  { %v1419_v37 = vsel %vm1418_vm4, %v1413_v35, %v1416_v36 }
 0xf70   :  { %v1420_v38 = vpack.c.bf16 %v1419_v37, %v1419_v37 }
 0xf72   :  { %1789 = vmatmul.msk.bf16.vlgmr.msrb.gmra.mxu0 %vm73_vm0, %v1420_v38 }
 0xfef   :  { %v1453_v42 = vpop.f32.mrf.mxu0 }
 0xff0   :  { %v1454_v43 = vadd.f32 %v1873_v41, %v1453_v42 }
 0xff2   :  { %1937 = vtanh.f32 %v1454_v43 }
 0xff7   :  { %v1455_v44 = vpop.f32.mrf.mxu0 }
 0xff8   :  { %v1938_v45 = vpop.eup %1937 }
 0xff9   :  { %v1458_v46 = vpack.c.bf16 %v1938_v45, %v1938_v45 }
 0xffb   :  { %1798 = vmatmul.msk.bf16.vlgmr.msrb.gmra.mxu1 %vm73_vm0, %v1458_v46 }
0x1078   :  { %v1491_v48 = vpop.f32.mrf.mxu1 }
0x1079   :  { %v1492_v49 = vadd.f32 %v1874_v47, %v1491_v48 }
0x107b   :  { %1496 = vst.msk [vmem:[#allocation2] sm:$0x3] %vm1495_vm5, %v1492_v49 }
0x107c   :  { %1507 = dma.vmem_to_hbm [thread:$0]  %s1503_s8, 32, %s1505_s24, [#allocation3]  }
0x1080   :  { %v1493_v53 = vpop.f32.mrf.mxu1 }
0x1081   :  { %1963 = dma.done.wait [#allocation3], 32  }
0x1082   :  { %1964 = vsyncadd [#allocation3], 4294967264 }
0x1083   :  { %1512 = vsyncpa [#allocation3], 1 }

</bundles_post_ra>
